<compile_context>
chip_gen: v6e
topology: v6e:2x2x1
jax: 0.10.0
libtpu: 0.0.40
codegen_flags: <defaults>
</compile_context>

<pallas_src>
import functools

import jax
import jax.numpy as jnp
from jax.experimental import pallas as pl
from jax.experimental.pallas import tpu as pltpu


# ----------------------------- kernel helpers ------------------------------

def _layer_norm(x, gamma, beta, eps=1e-5):
    # x: (N, D) f32, gamma/beta: (1, D) f32
    mu = jnp.mean(x, axis=-1, keepdims=True)
    xc = x - mu
    var = jnp.mean(xc * xc, axis=-1, keepdims=True)
    return xc * jax.lax.rsqrt(var + eps) * gamma + beta


def _mha(q_in, k_in, v_in, wq, bq, wk, bk, wv, bv, wo, bo,
         *, B, Lq, Lk, nhead):
    """Multi-head attention on batch-folded row slabs.

    q_in: (B*Lq, D) f32, k_in/v_in: (B*Lk, D) f32.
    wq/wk/wv: (D, D) bf16 (Wq already scaled by 1/sqrt(hd)).
    bq/bk/bv: (1, D) f32 (bq already scaled).
    wo: (nhead, hd, D) bf16, bo: (1, D) f32.
    Returns (B*Lq, D) f32.
    """
    f32, bf16 = jnp.float32, jnp.bfloat16
    D = q_in.shape[-1]
    hd = D // nhead

    q_bf = q_in.astype(bf16)
    k_bf = k_in.astype(bf16)
    v_bf = v_in.astype(bf16)

    # Fused full-width projections: one MXU matmul each (instead of nhead
    # narrow per-head matmuls).  Scale is pre-folded into wq/bq.
    q = jnp.dot(q_bf, wq, preferred_element_type=f32) + bq     # (B*Lq, D)
    k = jnp.dot(k_bf, wk, preferred_element_type=f32) + bk     # (B*Lk, D)
    v = jnp.dot(v_bf, wv, preferred_element_type=f32) + bv     # (B*Lk, D)

    q3 = q.reshape(B, Lq, D).astype(bf16)
    k3 = k.reshape(B, Lk, D).astype(bf16)
    v3 = v.reshape(B, Lk, D).astype(bf16)

    acc = None
    for h in range(nhead):                      # static unroll, nhead small
        sl = slice(h * hd, (h + 1) * hd)        # static lane slice per head
        s = jnp.einsum('bqh,bkh->bqk', q3[:, :, sl], k3[:, :, sl],
                       preferred_element_type=f32)              # (B, Lq, Lk)
        s = s - jnp.max(s, axis=-1, keepdims=True)
        e = jnp.exp(s)
        p = e * pl.reciprocal(jnp.sum(e, axis=-1, keepdims=True), approx=True)

        oh = jnp.einsum('bqk,bkh->bqh', p.astype(bf16), v3[:, :, sl],
                        preferred_element_type=f32)             # (B, Lq, hd)

        # accumulate per-head output projection instead of concatenating heads
        contrib = jnp.dot(oh.reshape(B * Lq, hd).astype(bf16), wo[h],
                          preferred_element_type=f32)           # (B*Lq, D)
        acc = contrib if acc is None else acc + contrib

    return acc + bo


def _decoder_layer_kernel(
    x_ref, qp_ref, mem_ref, pp_ref,
    sa_wq_ref, sa_bq_ref, sa_wk_ref, sa_bk_ref, sa_wv_ref, sa_bv_ref, sa_wo_ref, sa_bo_ref,
    ca_wq_ref, ca_bq_ref, ca_wk_ref, ca_bk_ref, ca_wv_ref, ca_bv_ref, ca_wo_ref, ca_bo_ref,
    w1_ref, b1_ref, w2_ref, b2_ref,
    g1_ref, be1_ref, g2_ref, be2_ref, g3_ref, be3_ref,
    out_ref,
    *, B, T, S, nhead,
):
    f32, bf16 = jnp.float32, jnp.bfloat16

    x = x_ref[...]        # (B*T, D) f32
    qp = qp_ref[...]      # (B*T, D)
    mem = mem_ref[...]    # (B*S, D)
    pp = pp_ref[...]      # (B*S, D)

    # --- self attention + residual + norm1 ---
    qk_in = x + qp
    sa = _mha(qk_in, qk_in, x,
              sa_wq_ref[...], sa_bq_ref[...], sa_wk_ref[...], sa_bk_ref[...],
              sa_wv_ref[...], sa_bv_ref[...], sa_wo_ref[...], sa_bo_ref[...],
              B=B, Lq=T, Lk=T, nhead=nhead)
    x = _layer_norm(x + sa, g1_ref[...], be1_ref[...])

    # --- cross attention + residual + norm2 ---
    ca = _mha(x + qp, mem + pp, mem,
              ca_wq_ref[...], ca_bq_ref[...], ca_wk_ref[...], ca_bk_ref[...],
              ca_wv_ref[...], ca_bv_ref[...], ca_wo_ref[...], ca_bo_ref[...],
              B=B, Lq=T, Lk=S, nhead=nhead)
    x = _layer_norm(x + ca, g2_ref[...], be2_ref[...])

    # --- feed-forward (relu) + residual + norm3 ---
    h = jnp.dot(x.astype(bf16), w1_ref[...], preferred_element_type=f32) + b1_ref[...]
    h = jnp.maximum(h, 0.0)
    ff = jnp.dot(h.astype(bf16), w2_ref[...], preferred_element_type=f32) + b2_ref[...]
    x = _layer_norm(x + ff, g3_ref[...], be3_ref[...])

    out_ref[...] = x


# ------------------------------ wrapper ------------------------------------

def _prep_attn(in_w, in_b, out_w, out_b, nhead, scale):
    """Pre-transpose / pre-scale attention weights (host-side, once)."""
    D = in_w.shape[1]
    hd = D // nhead
    bf16, f32 = jnp.bfloat16, jnp.float32

    wq = (in_w[0:D, :].T * scale).astype(bf16)        # (D, D), scale folded
    wk = in_w[D:2 * D, :].T.astype(bf16)              # (D, D)
    wv = in_w[2 * D:3 * D, :].T.astype(bf16)          # (D, D)

    bq = (in_b[:, 0:D] * scale).astype(f32)           # (1, D), scale folded
    bk = in_b[:, D:2 * D].astype(f32)
    bv = in_b[:, 2 * D:3 * D].astype(f32)

    wo = out_w.T.reshape(nhead, hd, D).astype(bf16)   # (nhead, hd, D)
    bo = out_b.astype(f32)                            # (1, D)
    return (wq, bq, wk, bk, wv, bv, wo, bo)


def transformer_decoder_layer(tgt, memory, params, pos, query_pos, nhead):
    """tgt: (T, B, D), memory: (S, B, D)  (PyTorch seq-first layout)."""
    T, B, D = tgt.shape
    S = memory.shape[0]
    assert D % nhead == 0, "d_model must be divisible by nhead"
    hd = D // nhead
    scale = 1.0 / float(hd) ** 0.5

    # fold (seq, batch) -> batch-major row slabs for position-wise ops
    def fold(x, L):
        return jnp.transpose(x, (1, 0, 2)).reshape(B * L, D)

    x2, qp2 = fold(tgt, T), fold(query_pos, T)
    m2, pp2 = fold(memory, S), fold(pos, S)

    p = params
    sa = _prep_attn(p["sa_in_w"], p["sa_in_b"], p["sa_out_w"], p["sa_out_b"], nhead, scale)
    ca = _prep_attn(p["ca_in_w"], p["ca_in_b"], p["ca_out_w"], p["ca_out_b"], nhead, scale)
    ffn_ln = (
        p["w1"].T.astype(jnp.bfloat16), p["b1"].astype(jnp.float32),
        p["w2"].T.astype(jnp.bfloat16), p["b2"].astype(jnp.float32),
        p["g1"], p["be1"], p["g2"], p["be2"], p["g3"], p["be3"],
    )

    n_inputs = 4 + len(sa) + len(ca) + len(ffn_ln)
    vmem_spec = pl.BlockSpec(memory_space=pltpu.MemorySpace.VMEM)

    # Whole problem (<1 MiB) lives in VMEM; single invocation, no grid.
    out2 = pl.pallas_call(
        functools.partial(_decoder_layer_kernel, B=B, T=T, S=S, nhead=nhead),
        out_shape=jax.ShapeDtypeStruct((B * T, D), jnp.float32),
        in_specs=[vmem_spec] * n_inputs,
        out_specs=vmem_spec,
    )(x2, qp2, m2, pp2, *sa, *ca, *ffn_ln)

    return jnp.transpose(out2.reshape(B, T, D), (1, 0, 2))  # back to (T, B, D)


# ------------------------- pure-JAX reference ------------------------------

def _reference(tgt, memory, params, pos, query_pos, nhead):
    def ln(x, g, b):
        mu = jnp.mean(x, -1, keepdims=True)
        var = jnp.mean((x - mu) ** 2, -1, keepdims=True)
        return (x - mu) / jnp.sqrt(var + 1e-5) * g + b

    def mha(q_in, k_in, v_in, in_w, in_b, out_w, out_b):
        D = q_in.shape[-1]
        hd = D // nhead
        q = q_in @ in_w[:D].T + in_b[0, :D]
        k = k_in @ in_w[D:2 * D].T + in_b[0, D:2 * D]
        v = v_in @ in_w[2 * D:].T + in_b[0, 2 * D:]
        outs = []
        for h in range(nhead):
            sl = slice(h * hd, (h + 1) * hd)
            s = (q[..., sl] / (hd ** 0.5)) @ jnp.swapaxes(k[..., sl], -1, -2)
            a = jax.nn.softmax(s, axis=-1)
            outs.append(a @ v[..., sl])
        return jnp.concatenate(outs, -1) @ out_w.T + out_b[0]

    p = params
    x = jnp.transpose(tgt, (1, 0, 2))
    mem = jnp.transpose(memory, (1, 0, 2))
    qp = jnp.transpose(query_pos, (1, 0, 2))
    pp = jnp.transpose(pos, (1, 0, 2))

    t2 = mha(x + qp, x + qp, x, p["sa_in_w"], p["sa_in_b"], p["sa_out_w"], p["sa_out_b"])
    x = ln(x + t2, p["g1"], p["be1"])
    t2 = mha(x + qp, mem + pp, mem, p["ca_in_w"], p["ca_in_b"], p["ca_out_w"], p["ca_out_b"])
    x = ln(x + t2, p["g2"], p["be2"])
    h = jnp.maximum(x @ p["w1"].T + p["b1"], 0.0)
    t2 = h @ p["w2"].T + p["b2"]
    x = ln(x + t2, p["g3"], p["be3"])
    return jnp.transpose(x, (1, 0, 2))


# --------------------------------- main -------------------------------------

if __name__ == "__main__":
    d_model, nhead, dim_ff = 32, 4, 64
    T, S, B = 8, 16, 2

    key = jax.random.PRNGKey(0)
    ks = jax.random.split(key, 16)

    def nrm(k, shape, scale=0.05):
        return (jax.random.normal(k, shape, jnp.float32) * scale).astype(jnp.float32)

    params = {
        "sa_in_w": nrm(ks[0], (3 * d_model, d_model)),
        "sa_in_b": nrm(ks[1], (1, 3 * d_model)),
        "sa_out_w": nrm(ks[2], (d_model, d_model)),
        "sa_out_b": nrm(ks[3], (1, d_model)),
        "ca_in_w": nrm(ks[4], (3 * d_model, d_model)),
        "ca_in_b": nrm(ks[5], (1, 3 * d_model)),
        "ca_out_w": nrm(ks[6], (d_model, d_model)),
        "ca_out_b": nrm(ks[7], (1, d_model)),
        "w1": nrm(ks[8], (dim_ff, d_model)),
        "b1": nrm(ks[9], (1, dim_ff)),
        "w2": nrm(ks[10], (d_model, dim_ff)),
        "b2": nrm(ks[11], (1, d_model)),
        "g1": jnp.ones((1, d_model), jnp.float32),
        "be1": jnp.zeros((1, d_model), jnp.float32),
        "g2": jnp.ones((1, d_model), jnp.float32),
        "be2": jnp.zeros((1, d_model), jnp.float32),
        "g3": jnp.ones((1, d_model), jnp.float32),
        "be3": jnp.zeros((1, d_model), jnp.float32),
    }

    kd = jax.random.split(ks[12], 4)
    tgt = jax.random.normal(kd[0], (T, B, d_model), jnp.float32)
    memory = jax.random.normal(kd[1], (S, B, d_model), jnp.float32)
    query_pos = jax.random.normal(kd[2], (T, B, d_model), jnp.float32)
    pos = jax.random.normal(kd[3], (S, B, d_model), jnp.float32)

    out = transformer_decoder_layer(tgt, memory, params, pos, query_pos, nhead)
    out = jax.block_until_ready(out)

    ref = _reference(tgt, memory, params, pos, query_pos, nhead)
    assert out.shape == (T, B, d_model)
    # bf16 matmul operands + approx reciprocal -> loosen tolerance vs f32 reference
    err = float(jnp.max(jnp.abs(out - ref)))
    assert err < 3e-2, f"mismatch vs reference: max abs err {err}"

    print("KERNEL_OK")
</pallas_src>

<mosaic_0001>
module attributes {stable_mosaic.version = 11 : i64} {
  func.func @_decoder_layer_kernel(%arg0: memref<16x32xf32, #tpu.memory_space<vmem>>, %arg1: memref<16x32xf32, #tpu.memory_space<vmem>>, %arg2: memref<32x32xf32, #tpu.memory_space<vmem>>, %arg3: memref<32x32xf32, #tpu.memory_space<vmem>>, %arg4: memref<32x32xbf16, #tpu.memory_space<vmem>>, %arg5: memref<1x32xf32, #tpu.memory_space<vmem>>, %arg6: memref<32x32xbf16, #tpu.memory_space<vmem>>, %arg7: memref<1x32xf32, #tpu.memory_space<vmem>>, %arg8: memref<32x32xbf16, #tpu.memory_space<vmem>>, %arg9: memref<1x32xf32, #tpu.memory_space<vmem>>, %arg10: memref<4x8x32xbf16, #tpu.memory_space<vmem>>, %arg11: memref<1x32xf32, #tpu.memory_space<vmem>>, %arg12: memref<32x32xbf16, #tpu.memory_space<vmem>>, %arg13: memref<1x32xf32, #tpu.memory_space<vmem>>, %arg14: memref<32x32xbf16, #tpu.memory_space<vmem>>, %arg15: memref<1x32xf32, #tpu.memory_space<vmem>>, %arg16: memref<32x32xbf16, #tpu.memory_space<vmem>>, %arg17: memref<1x32xf32, #tpu.memory_space<vmem>>, %arg18: memref<4x8x32xbf16, #tpu.memory_space<vmem>>, %arg19: memref<1x32xf32, #tpu.memory_space<vmem>>, %arg20: memref<32x64xbf16, #tpu.memory_space<vmem>>, %arg21: memref<1x64xf32, #tpu.memory_space<vmem>>, %arg22: memref<64x32xbf16, #tpu.memory_space<vmem>>, %arg23: memref<1x32xf32, #tpu.memory_space<vmem>>, %arg24: memref<1x32xf32, #tpu.memory_space<vmem>>, %arg25: memref<1x32xf32, #tpu.memory_space<vmem>>, %arg26: memref<1x32xf32, #tpu.memory_space<vmem>>, %arg27: memref<1x32xf32, #tpu.memory_space<vmem>>, %arg28: memref<1x32xf32, #tpu.memory_space<vmem>>, %arg29: memref<1x32xf32, #tpu.memory_space<vmem>>, %arg30: memref<16x32xf32, #tpu.memory_space<vmem>>) attributes {dimension_semantics = [], scalar_prefetch = 0 : i64, scratch_operands = 0 : i64, tpu.core_type = #tpu.core_type<tc>} {
    %c0 = arith.constant 0 : index
    %c0_0 = arith.constant 0 : index
    %0 = vector.load %arg0[%c0, %c0_0] : memref<16x32xf32, #tpu.memory_space<vmem>>, vector<16x32xf32>
    %c0_1 = arith.constant 0 : index
    %c0_2 = arith.constant 0 : index
    %1 = vector.load %arg1[%c0_1, %c0_2] : memref<16x32xf32, #tpu.memory_space<vmem>>, vector<16x32xf32>
    %c0_3 = arith.constant 0 : index
    %c0_4 = arith.constant 0 : index
    %2 = vector.load %arg2[%c0_3, %c0_4] : memref<32x32xf32, #tpu.memory_space<vmem>>, vector<32x32xf32>
    %c0_5 = arith.constant 0 : index
    %c0_6 = arith.constant 0 : index
    %3 = vector.load %arg3[%c0_5, %c0_6] : memref<32x32xf32, #tpu.memory_space<vmem>>, vector<32x32xf32>
    %4 = arith.addf %0, %1 : vector<16x32xf32>
    %c0_7 = arith.constant 0 : index
    %c0_8 = arith.constant 0 : index
    %5 = vector.load %arg4[%c0_7, %c0_8] : memref<32x32xbf16, #tpu.memory_space<vmem>>, vector<32x32xbf16>
    %c0_9 = arith.constant 0 : index
    %c0_10 = arith.constant 0 : index
    %6 = vector.load %arg5[%c0_9, %c0_10] : memref<1x32xf32, #tpu.memory_space<vmem>>, vector<1x32xf32>
    %c0_11 = arith.constant 0 : index
    %c0_12 = arith.constant 0 : index
    %7 = vector.load %arg6[%c0_11, %c0_12] : memref<32x32xbf16, #tpu.memory_space<vmem>>, vector<32x32xbf16>
    %c0_13 = arith.constant 0 : index
    %c0_14 = arith.constant 0 : index
    %8 = vector.load %arg7[%c0_13, %c0_14] : memref<1x32xf32, #tpu.memory_space<vmem>>, vector<1x32xf32>
    %c0_15 = arith.constant 0 : index
    %c0_16 = arith.constant 0 : index
    %9 = vector.load %arg8[%c0_15, %c0_16] : memref<32x32xbf16, #tpu.memory_space<vmem>>, vector<32x32xbf16>
    %c0_17 = arith.constant 0 : index
    %c0_18 = arith.constant 0 : index
    %10 = vector.load %arg9[%c0_17, %c0_18] : memref<1x32xf32, #tpu.memory_space<vmem>>, vector<1x32xf32>
    %c0_19 = arith.constant 0 : index
    %c0_20 = arith.constant 0 : index
    %c0_21 = arith.constant 0 : index
    %11 = vector.load %arg10[%c0_19, %c0_20, %c0_21] : memref<4x8x32xbf16, #tpu.memory_space<vmem>>, vector<4x8x32xbf16>
    %c0_22 = arith.constant 0 : index
    %c0_23 = arith.constant 0 : index
    %12 = vector.load %arg11[%c0_22, %c0_23] : memref<1x32xf32, #tpu.memory_space<vmem>>, vector<1x32xf32>
    %13 = arith.truncf %4 : vector<16x32xf32> to vector<16x32xbf16>
    %14 = arith.truncf %4 : vector<16x32xf32> to vector<16x32xbf16>
    %15 = arith.truncf %0 : vector<16x32xf32> to vector<16x32xbf16>
    %cst = arith.constant dense<0.000000e+00> : vector<16x32xf32>
    %16 = tpu.matmul %13, %5, %cst {dimension_numbers = #tpu.dot_dimension_numbers<[1], [0], [0], [1], [0, 0, 1, 1], [], []>} : vector<16x32xbf16>, vector<32x32xbf16>, vector<16x32xf32> -> vector<16x32xf32>
    %17 = vector.broadcast %6 : vector<1x32xf32> to vector<16x32xf32>
    %18 = arith.addf %16, %17 : vector<16x32xf32>
    %cst_24 = arith.constant dense<0.000000e+00> : vector<16x32xf32>
    %19 = tpu.matmul %14, %7, %cst_24 {dimension_numbers = #tpu.dot_dimension_numbers<[1], [0], [0], [1], [0, 0, 1, 1], [], []>} : vector<16x32xbf16>, vector<32x32xbf16>, vector<16x32xf32> -> vector<16x32xf32>
    %20 = vector.broadcast %8 : vector<1x32xf32> to vector<16x32xf32>
    %21 = arith.addf %19, %20 : vector<16x32xf32>
    %cst_25 = arith.constant dense<0.000000e+00> : vector<16x32xf32>
    %22 = tpu.matmul %15, %9, %cst_25 {dimension_numbers = #tpu.dot_dimension_numbers<[1], [0], [0], [1], [0, 0, 1, 1], [], []>} : vector<16x32xbf16>, vector<32x32xbf16>, vector<16x32xf32> -> vector<16x32xf32>
    %23 = vector.broadcast %10 : vector<1x32xf32> to vector<16x32xf32>
    %24 = arith.addf %22, %23 : vector<16x32xf32>
    %25 = vector.shape_cast %18 : vector<16x32xf32> to vector<2x8x32xf32>
    %26 = arith.truncf %25 : vector<2x8x32xf32> to vector<2x8x32xbf16>
    %27 = vector.shape_cast %21 : vector<16x32xf32> to vector<2x8x32xf32>
    %28 = arith.truncf %27 : vector<2x8x32xf32> to vector<2x8x32xbf16>
    %29 = vector.shape_cast %24 : vector<16x32xf32> to vector<2x8x32xf32>
    %30 = arith.truncf %29 : vector<2x8x32xf32> to vector<2x8x32xbf16>
    %31 = vector.extract_strided_slice %26 {offsets = [0, 0, 0], sizes = [2, 8, 8], strides = [1, 1, 1]} : vector<2x8x32xbf16> to vector<2x8x8xbf16>
    %32 = vector.extract_strided_slice %28 {offsets = [0, 0, 0], sizes = [2, 8, 8], strides = [1, 1, 1]} : vector<2x8x32xbf16> to vector<2x8x8xbf16>
    "tpu.trace_start"() <{level = 10 : i32, message = "bqh,bkh->bqk"}> : () -> ()
    %cst_26 = arith.constant dense<0.000000e+00> : vector<2x8x8xf32>
    %33 = tpu.matmul %31, %32, %cst_26 {dimension_numbers = #tpu.dot_dimension_numbers<[2], [2], [1], [1], [0, 0, 0, 1, 1, 1], [0], [0]>} : vector<2x8x8xbf16>, vector<2x8x8xbf16>, vector<2x8x8xf32> -> vector<2x8x8xf32>
    "tpu.trace_stop"() : () -> ()
    %cst_27 = arith.constant dense<0xFF800000> : vector<2x8xf32>
    %34 = vector.multi_reduction <maximumf>, %33, %cst_27 [2] : vector<2x8x8xf32> to vector<2x8xf32>
    %35 = vector.shape_cast %34 : vector<2x8xf32> to vector<2x8x1xf32>
    %36 = vector.broadcast %35 : vector<2x8x1xf32> to vector<2x8x8xf32>
    %37 = arith.subf %33, %36 : vector<2x8x8xf32>
    %38 = math.exp %37 : vector<2x8x8xf32>
    %cst_28 = arith.constant dense<0.000000e+00> : vector<2x8xf32>
    %39 = vector.multi_reduction <add>, %38, %cst_28 [2] : vector<2x8x8xf32> to vector<2x8xf32>
    %40 = vector.shape_cast %39 : vector<2x8xf32> to vector<2x8x1xf32>
    %41 = tpu.reciprocal %40 {approx = true} : vector<2x8x1xf32> -> vector<2x8x1xf32>
    %42 = vector.broadcast %41 : vector<2x8x1xf32> to vector<2x8x8xf32>
    %43 = arith.mulf %38, %42 : vector<2x8x8xf32>
    %44 = arith.truncf %43 : vector<2x8x8xf32> to vector<2x8x8xbf16>
    %45 = vector.extract_strided_slice %30 {offsets = [0, 0, 0], sizes = [2, 8, 8], strides = [1, 1, 1]} : vector<2x8x32xbf16> to vector<2x8x8xbf16>
    "tpu.trace_start"() <{level = 10 : i32, message = "bqk,bkh->bqh"}> : () -> ()
    %cst_29 = arith.constant dense<0.000000e+00> : vector<2x8x8xf32>
    %46 = tpu.matmul %44, %45, %cst_29 {dimension_numbers = #tpu.dot_dimension_numbers<[2], [1], [1], [2], [0, 0, 0, 1, 1, 2], [0], [0]>} : vector<2x8x8xbf16>, vector<2x8x8xbf16>, vector<2x8x8xf32> -> vector<2x8x8xf32>
    "tpu.trace_stop"() : () -> ()
    %47 = vector.shape_cast %46 : vector<2x8x8xf32> to vector<16x8xf32>
    %48 = arith.truncf %47 : vector<16x8xf32> to vector<16x8xbf16>
    %49 = vector.extract_strided_slice %11 {offsets = [0, 0, 0], sizes = [1, 8, 32], strides = [1, 1, 1]} : vector<4x8x32xbf16> to vector<1x8x32xbf16>
    %50 = vector.shape_cast %49 : vector<1x8x32xbf16> to vector<8x32xbf16>
    %cst_30 = arith.constant dense<0.000000e+00> : vector<16x32xf32>
    %51 = tpu.matmul %48, %50, %cst_30 {dimension_numbers = #tpu.dot_dimension_numbers<[1], [0], [0], [1], [0, 0, 1, 1], [], []>} : vector<16x8xbf16>, vector<8x32xbf16>, vector<16x32xf32> -> vector<16x32xf32>
    %52 = vector.extract_strided_slice %26 {offsets = [0, 0, 8], sizes = [2, 8, 8], strides = [1, 1, 1]} : vector<2x8x32xbf16> to vector<2x8x8xbf16>
    %53 = vector.extract_strided_slice %28 {offsets = [0, 0, 8], sizes = [2, 8, 8], strides = [1, 1, 1]} : vector<2x8x32xbf16> to vector<2x8x8xbf16>
    "tpu.trace_start"() <{level = 10 : i32, message = "bqh,bkh->bqk"}> : () -> ()
    %cst_31 = arith.constant dense<0.000000e+00> : vector<2x8x8xf32>
    %54 = tpu.matmul %52, %53, %cst_31 {dimension_numbers = #tpu.dot_dimension_numbers<[2], [2], [1], [1], [0, 0, 0, 1, 1, 1], [0], [0]>} : vector<2x8x8xbf16>, vector<2x8x8xbf16>, vector<2x8x8xf32> -> vector<2x8x8xf32>
    "tpu.trace_stop"() : () -> ()
    %cst_32 = arith.constant dense<0xFF800000> : vector<2x8xf32>
    %55 = vector.multi_reduction <maximumf>, %54, %cst_32 [2] : vector<2x8x8xf32> to vector<2x8xf32>
    %56 = vector.shape_cast %55 : vector<2x8xf32> to vector<2x8x1xf32>
    %57 = vector.broadcast %56 : vector<2x8x1xf32> to vector<2x8x8xf32>
    %58 = arith.subf %54, %57 : vector<2x8x8xf32>
    %59 = math.exp %58 : vector<2x8x8xf32>
    %cst_33 = arith.constant dense<0.000000e+00> : vector<2x8xf32>
    %60 = vector.multi_reduction <add>, %59, %cst_33 [2] : vector<2x8x8xf32> to vector<2x8xf32>
    %61 = vector.shape_cast %60 : vector<2x8xf32> to vector<2x8x1xf32>
    %62 = tpu.reciprocal %61 {approx = true} : vector<2x8x1xf32> -> vector<2x8x1xf32>
    %63 = vector.broadcast %62 : vector<2x8x1xf32> to vector<2x8x8xf32>
    %64 = arith.mulf %59, %63 : vector<2x8x8xf32>
    %65 = arith.truncf %64 : vector<2x8x8xf32> to vector<2x8x8xbf16>
    %66 = vector.extract_strided_slice %30 {offsets = [0, 0, 8], sizes = [2, 8, 8], strides = [1, 1, 1]} : vector<2x8x32xbf16> to vector<2x8x8xbf16>
    "tpu.trace_start"() <{level = 10 : i32, message = "bqk,bkh->bqh"}> : () -> ()
    %cst_34 = arith.constant dense<0.000000e+00> : vector<2x8x8xf32>
    %67 = tpu.matmul %65, %66, %cst_34 {dimension_numbers = #tpu.dot_dimension_numbers<[2], [1], [1], [2], [0, 0, 0, 1, 1, 2], [0], [0]>} : vector<2x8x8xbf16>, vector<2x8x8xbf16>, vector<2x8x8xf32> -> vector<2x8x8xf32>
    "tpu.trace_stop"() : () -> ()
    %68 = vector.shape_cast %67 : vector<2x8x8xf32> to vector<16x8xf32>
    %69 = arith.truncf %68 : vector<16x8xf32> to vector<16x8xbf16>
    %70 = vector.extract_strided_slice %11 {offsets = [1, 0, 0], sizes = [1, 8, 32], strides = [1, 1, 1]} : vector<4x8x32xbf16> to vector<1x8x32xbf16>
    %71 = vector.shape_cast %70 : vector<1x8x32xbf16> to vector<8x32xbf16>
    %cst_35 = arith.constant dense<0.000000e+00> : vector<16x32xf32>
    %72 = tpu.matmul %69, %71, %cst_35 {dimension_numbers = #tpu.dot_dimension_numbers<[1], [0], [0], [1], [0, 0, 1, 1], [], []>} : vector<16x8xbf16>, vector<8x32xbf16>, vector<16x32xf32> -> vector<16x32xf32>
    %73 = arith.addf %51, %72 : vector<16x32xf32>
    %74 = vector.extract_strided_slice %26 {offsets = [0, 0, 16], sizes = [2, 8, 8], strides = [1, 1, 1]} : vector<2x8x32xbf16> to vector<2x8x8xbf16>
    %75 = vector.extract_strided_slice %28 {offsets = [0, 0, 16], sizes = [2, 8, 8], strides = [1, 1, 1]} : vector<2x8x32xbf16> to vector<2x8x8xbf16>
    "tpu.trace_start"() <{level = 10 : i32, message = "bqh,bkh->bqk"}> : () -> ()
    %cst_36 = arith.constant dense<0.000000e+00> : vector<2x8x8xf32>
    %76 = tpu.matmul %74, %75, %cst_36 {dimension_numbers = #tpu.dot_dimension_numbers<[2], [2], [1], [1], [0, 0, 0, 1, 1, 1], [0], [0]>} : vector<2x8x8xbf16>, vector<2x8x8xbf16>, vector<2x8x8xf32> -> vector<2x8x8xf32>
    "tpu.trace_stop"() : () -> ()
    %cst_37 = arith.constant dense<0xFF800000> : vector<2x8xf32>
    %77 = vector.multi_reduction <maximumf>, %76, %cst_37 [2] : vector<2x8x8xf32> to vector<2x8xf32>
    %78 = vector.shape_cast %77 : vector<2x8xf32> to vector<2x8x1xf32>
    %79 = vector.broadcast %78 : vector<2x8x1xf32> to vector<2x8x8xf32>
    %80 = arith.subf %76, %79 : vector<2x8x8xf32>
    %81 = math.exp %80 : vector<2x8x8xf32>
    %cst_38 = arith.constant dense<0.000000e+00> : vector<2x8xf32>
    %82 = vector.multi_reduction <add>, %81, %cst_38 [2] : vector<2x8x8xf32> to vector<2x8xf32>
    %83 = vector.shape_cast %82 : vector<2x8xf32> to vector<2x8x1xf32>
    %84 = tpu.reciprocal %83 {approx = true} : vector<2x8x1xf32> -> vector<2x8x1xf32>
    %85 = vector.broadcast %84 : vector<2x8x1xf32> to vector<2x8x8xf32>
    %86 = arith.mulf %81, %85 : vector<2x8x8xf32>
    %87 = arith.truncf %86 : vector<2x8x8xf32> to vector<2x8x8xbf16>
    %88 = vector.extract_strided_slice %30 {offsets = [0, 0, 16], sizes = [2, 8, 8], strides = [1, 1, 1]} : vector<2x8x32xbf16> to vector<2x8x8xbf16>
    "tpu.trace_start"() <{level = 10 : i32, message = "bqk,bkh->bqh"}> : () -> ()
    %cst_39 = arith.constant dense<0.000000e+00> : vector<2x8x8xf32>
    %89 = tpu.matmul %87, %88, %cst_39 {dimension_numbers = #tpu.dot_dimension_numbers<[2], [1], [1], [2], [0, 0, 0, 1, 1, 2], [0], [0]>} : vector<2x8x8xbf16>, vector<2x8x8xbf16>, vector<2x8x8xf32> -> vector<2x8x8xf32>
    "tpu.trace_stop"() : () -> ()
    %90 = vector.shape_cast %89 : vector<2x8x8xf32> to vector<16x8xf32>
    %91 = arith.truncf %90 : vector<16x8xf32> to vector<16x8xbf16>
    %92 = vector.extract_strided_slice %11 {offsets = [2, 0, 0], sizes = [1, 8, 32], strides = [1, 1, 1]} : vector<4x8x32xbf16> to vector<1x8x32xbf16>
    %93 = vector.shape_cast %92 : vector<1x8x32xbf16> to vector<8x32xbf16>
    %cst_40 = arith.constant dense<0.000000e+00> : vector<16x32xf32>
    %94 = tpu.matmul %91, %93, %cst_40 {dimension_numbers = #tpu.dot_dimension_numbers<[1], [0], [0], [1], [0, 0, 1, 1], [], []>} : vector<16x8xbf16>, vector<8x32xbf16>, vector<16x32xf32> -> vector<16x32xf32>
    %95 = arith.addf %73, %94 : vector<16x32xf32>
    %96 = vector.extract_strided_slice %26 {offsets = [0, 0, 24], sizes = [2, 8, 8], strides = [1, 1, 1]} : vector<2x8x32xbf16> to vector<2x8x8xbf16>
    %97 = vector.extract_strided_slice %28 {offsets = [0, 0, 24], sizes = [2, 8, 8], strides = [1, 1, 1]} : vector<2x8x32xbf16> to vector<2x8x8xbf16>
    "tpu.trace_start"() <{level = 10 : i32, message = "bqh,bkh->bqk"}> : () -> ()
    %cst_41 = arith.constant dense<0.000000e+00> : vector<2x8x8xf32>
    %98 = tpu.matmul %96, %97, %cst_41 {dimension_numbers = #tpu.dot_dimension_numbers<[2], [2], [1], [1], [0, 0, 0, 1, 1, 1], [0], [0]>} : vector<2x8x8xbf16>, vector<2x8x8xbf16>, vector<2x8x8xf32> -> vector<2x8x8xf32>
    "tpu.trace_stop"() : () -> ()
    %cst_42 = arith.constant dense<0xFF800000> : vector<2x8xf32>
    %99 = vector.multi_reduction <maximumf>, %98, %cst_42 [2] : vector<2x8x8xf32> to vector<2x8xf32>
    %100 = vector.shape_cast %99 : vector<2x8xf32> to vector<2x8x1xf32>
    %101 = vector.broadcast %100 : vector<2x8x1xf32> to vector<2x8x8xf32>
    %102 = arith.subf %98, %101 : vector<2x8x8xf32>
    %103 = math.exp %102 : vector<2x8x8xf32>
    %cst_43 = arith.constant dense<0.000000e+00> : vector<2x8xf32>
    %104 = vector.multi_reduction <add>, %103, %cst_43 [2] : vector<2x8x8xf32> to vector<2x8xf32>
    %105 = vector.shape_cast %104 : vector<2x8xf32> to vector<2x8x1xf32>
    %106 = tpu.reciprocal %105 {approx = true} : vector<2x8x1xf32> -> vector<2x8x1xf32>
    %107 = vector.broadcast %106 : vector<2x8x1xf32> to vector<2x8x8xf32>
    %108 = arith.mulf %103, %107 : vector<2x8x8xf32>
    %109 = arith.truncf %108 : vector<2x8x8xf32> to vector<2x8x8xbf16>
    %110 = vector.extract_strided_slice %30 {offsets = [0, 0, 24], sizes = [2, 8, 8], strides = [1, 1, 1]} : vector<2x8x32xbf16> to vector<2x8x8xbf16>
    "tpu.trace_start"() <{level = 10 : i32, message = "bqk,bkh->bqh"}> : () -> ()
    %cst_44 = arith.constant dense<0.000000e+00> : vector<2x8x8xf32>
    %111 = tpu.matmul %109, %110, %cst_44 {dimension_numbers = #tpu.dot_dimension_numbers<[2], [1], [1], [2], [0, 0, 0, 1, 1, 2], [0], [0]>} : vector<2x8x8xbf16>, vector<2x8x8xbf16>, vector<2x8x8xf32> -> vector<2x8x8xf32>
    "tpu.trace_stop"() : () -> ()
    %112 = vector.shape_cast %111 : vector<2x8x8xf32> to vector<16x8xf32>
    %113 = arith.truncf %112 : vector<16x8xf32> to vector<16x8xbf16>
    %114 = vector.extract_strided_slice %11 {offsets = [3, 0, 0], sizes = [1, 8, 32], strides = [1, 1, 1]} : vector<4x8x32xbf16> to vector<1x8x32xbf16>
    %115 = vector.shape_cast %114 : vector<1x8x32xbf16> to vector<8x32xbf16>
    %cst_45 = arith.constant dense<0.000000e+00> : vector<16x32xf32>
    %116 = tpu.matmul %113, %115, %cst_45 {dimension_numbers = #tpu.dot_dimension_numbers<[1], [0], [0], [1], [0, 0, 1, 1], [], []>} : vector<16x8xbf16>, vector<8x32xbf16>, vector<16x32xf32> -> vector<16x32xf32>
    %117 = arith.addf %95, %116 : vector<16x32xf32>
    %118 = vector.broadcast %12 : vector<1x32xf32> to vector<16x32xf32>
    %119 = arith.addf %117, %118 : vector<16x32xf32>
    %120 = arith.addf %0, %119 : vector<16x32xf32>
    %c0_46 = arith.constant 0 : index
    %c0_47 = arith.constant 0 : index
    %121 = vector.load %arg24[%c0_46, %c0_47] : memref<1x32xf32, #tpu.memory_space<vmem>>, vector<1x32xf32>
    %c0_48 = arith.constant 0 : index
    %c0_49 = arith.constant 0 : index
    %122 = vector.load %arg25[%c0_48, %c0_49] : memref<1x32xf32, #tpu.memory_space<vmem>>, vector<1x32xf32>
    %cst_50 = arith.constant dense<0.000000e+00> : vector<16xf32>
    %123 = vector.multi_reduction <add>, %120, %cst_50 [1] : vector<16x32xf32> to vector<16xf32>
    %124 = vector.shape_cast %123 : vector<16xf32> to vector<16x1xf32>
    %cst_51 = arith.constant 3.200000e+01 : f32
    %125 = vector.broadcast %cst_51 : f32 to vector<16x1xf32>
    %126 = arith.divf %124, %125 : vector<16x1xf32>
    %127 = vector.broadcast %126 : vector<16x1xf32> to vector<16x32xf32>
    %128 = arith.subf %120, %127 : vector<16x32xf32>
    %129 = arith.mulf %128, %128 : vector<16x32xf32>
    %cst_52 = arith.constant dense<0.000000e+00> : vector<16xf32>
    %130 = vector.multi_reduction <add>, %129, %cst_52 [1] : vector<16x32xf32> to vector<16xf32>
    %131 = vector.shape_cast %130 : vector<16xf32> to vector<16x1xf32>
    %cst_53 = arith.constant 3.200000e+01 : f32
    %132 = vector.broadcast %cst_53 : f32 to vector<16x1xf32>
    %133 = arith.divf %131, %132 : vector<16x1xf32>
    %cst_54 = arith.constant 9.99999974E-6 : f32
    %134 = vector.broadcast %cst_54 : f32 to vector<16x1xf32>
    %135 = arith.addf %133, %134 : vector<16x1xf32>
    %136 = math.rsqrt %135 : vector<16x1xf32>
    %137 = vector.broadcast %136 : vector<16x1xf32> to vector<16x32xf32>
    %138 = arith.mulf %128, %137 : vector<16x32xf32>
    %139 = vector.broadcast %121 : vector<1x32xf32> to vector<16x32xf32>
    %140 = arith.mulf %138, %139 : vector<16x32xf32>
    %141 = vector.broadcast %122 : vector<1x32xf32> to vector<16x32xf32>
    %142 = arith.addf %140, %141 : vector<16x32xf32>
    %143 = arith.addf %142, %1 : vector<16x32xf32>
    %144 = arith.addf %2, %3 : vector<32x32xf32>
    %c0_55 = arith.constant 0 : index
    %c0_56 = arith.constant 0 : index
    %145 = vector.load %arg12[%c0_55, %c0_56] : memref<32x32xbf16, #tpu.memory_space<vmem>>, vector<32x32xbf16>
    %c0_57 = arith.constant 0 : index
    %c0_58 = arith.constant 0 : index
    %146 = vector.load %arg13[%c0_57, %c0_58] : memref<1x32xf32, #tpu.memory_space<vmem>>, vector<1x32xf32>
    %c0_59 = arith.constant 0 : index
    %c0_60 = arith.constant 0 : index
    %147 = vector.load %arg14[%c0_59, %c0_60] : memref<32x32xbf16, #tpu.memory_space<vmem>>, vector<32x32xbf16>
    %c0_61 = arith.constant 0 : index
    %c0_62 = arith.constant 0 : index
    %148 = vector.load %arg15[%c0_61, %c0_62] : memref<1x32xf32, #tpu.memory_space<vmem>>, vector<1x32xf32>
    %c0_63 = arith.constant 0 : index
    %c0_64 = arith.constant 0 : index
    %149 = vector.load %arg16[%c0_63, %c0_64] : memref<32x32xbf16, #tpu.memory_space<vmem>>, vector<32x32xbf16>
    %c0_65 = arith.constant 0 : index
    %c0_66 = arith.constant 0 : index
    %150 = vector.load %arg17[%c0_65, %c0_66] : memref<1x32xf32, #tpu.memory_space<vmem>>, vector<1x32xf32>
    %c0_67 = arith.constant 0 : index
    %c0_68 = arith.constant 0 : index
    %c0_69 = arith.constant 0 : index
    %151 = vector.load %arg18[%c0_67, %c0_68, %c0_69] : memref<4x8x32xbf16, #tpu.memory_space<vmem>>, vector<4x8x32xbf16>
    %c0_70 = arith.constant 0 : index
    %c0_71 = arith.constant 0 : index
    %152 = vector.load %arg19[%c0_70, %c0_71] : memref<1x32xf32, #tpu.memory_space<vmem>>, vector<1x32xf32>
    %153 = arith.truncf %143 : vector<16x32xf32> to vector<16x32xbf16>
    %154 = arith.truncf %144 : vector<32x32xf32> to vector<32x32xbf16>
    %155 = arith.truncf %2 : vector<32x32xf32> to vector<32x32xbf16>
    %cst_72 = arith.constant dense<0.000000e+00> : vector<16x32xf32>
    %156 = tpu.matmul %153, %145, %cst_72 {dimension_numbers = #tpu.dot_dimension_numbers<[1], [0], [0], [1], [0, 0, 1, 1], [], []>} : vector<16x32xbf16>, vector<32x32xbf16>, vector<16x32xf32> -> vector<16x32xf32>
    %157 = vector.broadcast %146 : vector<1x32xf32> to vector<16x32xf32>
    %158 = arith.addf %156, %157 : vector<16x32xf32>
    %cst_73 = arith.constant dense<0.000000e+00> : vector<32x32xf32>
    %159 = tpu.matmul %154, %147, %cst_73 {dimension_numbers = #tpu.dot_dimension_numbers<[1], [0], [0], [1], [0, 0, 1, 1], [], []>} : vector<32x32xbf16>, vector<32x32xbf16>, vector<32x32xf32> -> vector<32x32xf32>
    %160 = vector.broadcast %148 : vector<1x32xf32> to vector<32x32xf32>
    %161 = arith.addf %159, %160 : vector<32x32xf32>
    %cst_74 = arith.constant dense<0.000000e+00> : vector<32x32xf32>
    %162 = tpu.matmul %155, %149, %cst_74 {dimension_numbers = #tpu.dot_dimension_numbers<[1], [0], [0], [1], [0, 0, 1, 1], [], []>} : vector<32x32xbf16>, vector<32x32xbf16>, vector<32x32xf32> -> vector<32x32xf32>
    %163 = vector.broadcast %150 : vector<1x32xf32> to vector<32x32xf32>
    %164 = arith.addf %162, %163 : vector<32x32xf32>
    %165 = vector.shape_cast %158 : vector<16x32xf32> to vector<2x8x32xf32>
    %166 = arith.truncf %165 : vector<2x8x32xf32> to vector<2x8x32xbf16>
    %167 = vector.shape_cast %161 : vector<32x32xf32> to vector<2x16x32xf32>
    %168 = arith.truncf %167 : vector<2x16x32xf32> to vector<2x16x32xbf16>
    %169 = vector.shape_cast %164 : vector<32x32xf32> to vector<2x16x32xf32>
    %170 = arith.truncf %169 : vector<2x16x32xf32> to vector<2x16x32xbf16>
    %171 = vector.extract_strided_slice %166 {offsets = [0, 0, 0], sizes = [2, 8, 8], strides = [1, 1, 1]} : vector<2x8x32xbf16> to vector<2x8x8xbf16>
    %172 = vector.extract_strided_slice %168 {offsets = [0, 0, 0], sizes = [2, 16, 8], strides = [1, 1, 1]} : vector<2x16x32xbf16> to vector<2x16x8xbf16>
    "tpu.trace_start"() <{level = 10 : i32, message = "bqh,bkh->bqk"}> : () -> ()
    %cst_75 = arith.constant dense<0.000000e+00> : vector<2x8x16xf32>
    %173 = tpu.matmul %171, %172, %cst_75 {dimension_numbers = #tpu.dot_dimension_numbers<[2], [2], [1], [1], [0, 0, 0, 1, 1, 1], [0], [0]>} : vector<2x8x8xbf16>, vector<2x16x8xbf16>, vector<2x8x16xf32> -> vector<2x8x16xf32>
    "tpu.trace_stop"() : () -> ()
    %cst_76 = arith.constant dense<0xFF800000> : vector<2x8xf32>
    %174 = vector.multi_reduction <maximumf>, %173, %cst_76 [2] : vector<2x8x16xf32> to vector<2x8xf32>
    %175 = vector.shape_cast %174 : vector<2x8xf32> to vector<2x8x1xf32>
    %176 = vector.broadcast %175 : vector<2x8x1xf32> to vector<2x8x16xf32>
    %177 = arith.subf %173, %176 : vector<2x8x16xf32>
    %178 = math.exp %177 : vector<2x8x16xf32>
    %cst_77 = arith.constant dense<0.000000e+00> : vector<2x8xf32>
    %179 = vector.multi_reduction <add>, %178, %cst_77 [2] : vector<2x8x16xf32> to vector<2x8xf32>
    %180 = vector.shape_cast %179 : vector<2x8xf32> to vector<2x8x1xf32>
    %181 = tpu.reciprocal %180 {approx = true} : vector<2x8x1xf32> -> vector<2x8x1xf32>
    %182 = vector.broadcast %181 : vector<2x8x1xf32> to vector<2x8x16xf32>
    %183 = arith.mulf %178, %182 : vector<2x8x16xf32>
    %184 = arith.truncf %183 : vector<2x8x16xf32> to vector<2x8x16xbf16>
    %185 = vector.extract_strided_slice %170 {offsets = [0, 0, 0], sizes = [2, 16, 8], strides = [1, 1, 1]} : vector<2x16x32xbf16> to vector<2x16x8xbf16>
    "tpu.trace_start"() <{level = 10 : i32, message = "bqk,bkh->bqh"}> : () -> ()
    %cst_78 = arith.constant dense<0.000000e+00> : vector<2x8x8xf32>
    %186 = tpu.matmul %184, %185, %cst_78 {dimension_numbers = #tpu.dot_dimension_numbers<[2], [1], [1], [2], [0, 0, 0, 1, 1, 2], [0], [0]>} : vector<2x8x16xbf16>, vector<2x16x8xbf16>, vector<2x8x8xf32> -> vector<2x8x8xf32>
    "tpu.trace_stop"() : () -> ()
    %187 = vector.shape_cast %186 : vector<2x8x8xf32> to vector<16x8xf32>
    %188 = arith.truncf %187 : vector<16x8xf32> to vector<16x8xbf16>
    %189 = vector.extract_strided_slice %151 {offsets = [0, 0, 0], sizes = [1, 8, 32], strides = [1, 1, 1]} : vector<4x8x32xbf16> to vector<1x8x32xbf16>
    %190 = vector.shape_cast %189 : vector<1x8x32xbf16> to vector<8x32xbf16>
    %cst_79 = arith.constant dense<0.000000e+00> : vector<16x32xf32>
    %191 = tpu.matmul %188, %190, %cst_79 {dimension_numbers = #tpu.dot_dimension_numbers<[1], [0], [0], [1], [0, 0, 1, 1], [], []>} : vector<16x8xbf16>, vector<8x32xbf16>, vector<16x32xf32> -> vector<16x32xf32>
    %192 = vector.extract_strided_slice %166 {offsets = [0, 0, 8], sizes = [2, 8, 8], strides = [1, 1, 1]} : vector<2x8x32xbf16> to vector<2x8x8xbf16>
    %193 = vector.extract_strided_slice %168 {offsets = [0, 0, 8], sizes = [2, 16, 8], strides = [1, 1, 1]} : vector<2x16x32xbf16> to vector<2x16x8xbf16>
    "tpu.trace_start"() <{level = 10 : i32, message = "bqh,bkh->bqk"}> : () -> ()
    %cst_80 = arith.constant dense<0.000000e+00> : vector<2x8x16xf32>
    %194 = tpu.matmul %192, %193, %cst_80 {dimension_numbers = #tpu.dot_dimension_numbers<[2], [2], [1], [1], [0, 0, 0, 1, 1, 1], [0], [0]>} : vector<2x8x8xbf16>, vector<2x16x8xbf16>, vector<2x8x16xf32> -> vector<2x8x16xf32>
    "tpu.trace_stop"() : () -> ()
    %cst_81 = arith.constant dense<0xFF800000> : vector<2x8xf32>
    %195 = vector.multi_reduction <maximumf>, %194, %cst_81 [2] : vector<2x8x16xf32> to vector<2x8xf32>
    %196 = vector.shape_cast %195 : vector<2x8xf32> to vector<2x8x1xf32>
    %197 = vector.broadcast %196 : vector<2x8x1xf32> to vector<2x8x16xf32>
    %198 = arith.subf %194, %197 : vector<2x8x16xf32>
    %199 = math.exp %198 : vector<2x8x16xf32>
    %cst_82 = arith.constant dense<0.000000e+00> : vector<2x8xf32>
    %200 = vector.multi_reduction <add>, %199, %cst_82 [2] : vector<2x8x16xf32> to vector<2x8xf32>
    %201 = vector.shape_cast %200 : vector<2x8xf32> to vector<2x8x1xf32>
    %202 = tpu.reciprocal %201 {approx = true} : vector<2x8x1xf32> -> vector<2x8x1xf32>
    %203 = vector.broadcast %202 : vector<2x8x1xf32> to vector<2x8x16xf32>
    %204 = arith.mulf %199, %203 : vector<2x8x16xf32>
    %205 = arith.truncf %204 : vector<2x8x16xf32> to vector<2x8x16xbf16>
    %206 = vector.extract_strided_slice %170 {offsets = [0, 0, 8], sizes = [2, 16, 8], strides = [1, 1, 1]} : vector<2x16x32xbf16> to vector<2x16x8xbf16>
    "tpu.trace_start"() <{level = 10 : i32, message = "bqk,bkh->bqh"}> : () -> ()
    %cst_83 = arith.constant dense<0.000000e+00> : vector<2x8x8xf32>
    %207 = tpu.matmul %205, %206, %cst_83 {dimension_numbers = #tpu.dot_dimension_numbers<[2], [1], [1], [2], [0, 0, 0, 1, 1, 2], [0], [0]>} : vector<2x8x16xbf16>, vector<2x16x8xbf16>, vector<2x8x8xf32> -> vector<2x8x8xf32>
    "tpu.trace_stop"() : () -> ()
    %208 = vector.shape_cast %207 : vector<2x8x8xf32> to vector<16x8xf32>
    %209 = arith.truncf %208 : vector<16x8xf32> to vector<16x8xbf16>
    %210 = vector.extract_strided_slice %151 {offsets = [1, 0, 0], sizes = [1, 8, 32], strides = [1, 1, 1]} : vector<4x8x32xbf16> to vector<1x8x32xbf16>
    %211 = vector.shape_cast %210 : vector<1x8x32xbf16> to vector<8x32xbf16>
    %cst_84 = arith.constant dense<0.000000e+00> : vector<16x32xf32>
    %212 = tpu.matmul %209, %211, %cst_84 {dimension_numbers = #tpu.dot_dimension_numbers<[1], [0], [0], [1], [0, 0, 1, 1], [], []>} : vector<16x8xbf16>, vector<8x32xbf16>, vector<16x32xf32> -> vector<16x32xf32>
    %213 = arith.addf %191, %212 : vector<16x32xf32>
    %214 = vector.extract_strided_slice %166 {offsets = [0, 0, 16], sizes = [2, 8, 8], strides = [1, 1, 1]} : vector<2x8x32xbf16> to vector<2x8x8xbf16>
    %215 = vector.extract_strided_slice %168 {offsets = [0, 0, 16], sizes = [2, 16, 8], strides = [1, 1, 1]} : vector<2x16x32xbf16> to vector<2x16x8xbf16>
    "tpu.trace_start"() <{level = 10 : i32, message = "bqh,bkh->bqk"}> : () -> ()
    %cst_85 = arith.constant dense<0.000000e+00> : vector<2x8x16xf32>
    %216 = tpu.matmul %214, %215, %cst_85 {dimension_numbers = #tpu.dot_dimension_numbers<[2], [2], [1], [1], [0, 0, 0, 1, 1, 1], [0], [0]>} : vector<2x8x8xbf16>, vector<2x16x8xbf16>, vector<2x8x16xf32> -> vector<2x8x16xf32>
    "tpu.trace_stop"() : () -> ()
    %cst_86 = arith.constant dense<0xFF800000> : vector<2x8xf32>
    %217 = vector.multi_reduction <maximumf>, %216, %cst_86 [2] : vector<2x8x16xf32> to vector<2x8xf32>
    %218 = vector.shape_cast %217 : vector<2x8xf32> to vector<2x8x1xf32>
    %219 = vector.broadcast %218 : vector<2x8x1xf32> to vector<2x8x16xf32>
    %220 = arith.subf %216, %219 : vector<2x8x16xf32>
    %221 = math.exp %220 : vector<2x8x16xf32>
    %cst_87 = arith.constant dense<0.000000e+00> : vector<2x8xf32>
    %222 = vector.multi_reduction <add>, %221, %cst_87 [2] : vector<2x8x16xf32> to vector<2x8xf32>
    %223 = vector.shape_cast %222 : vector<2x8xf32> to vector<2x8x1xf32>
    %224 = tpu.reciprocal %223 {approx = true} : vector<2x8x1xf32> -> vector<2x8x1xf32>
    %225 = vector.broadcast %224 : vector<2x8x1xf32> to vector<2x8x16xf32>
    %226 = arith.mulf %221, %225 : vector<2x8x16xf32>
    %227 = arith.truncf %226 : vector<2x8x16xf32> to vector<2x8x16xbf16>
    %228 = vector.extract_strided_slice %170 {offsets = [0, 0, 16], sizes = [2, 16, 8], strides = [1, 1, 1]} : vector<2x16x32xbf16> to vector<2x16x8xbf16>
    "tpu.trace_start"() <{level = 10 : i32, message = "bqk,bkh->bqh"}> : () -> ()
    %cst_88 = arith.constant dense<0.000000e+00> : vector<2x8x8xf32>
    %229 = tpu.matmul %227, %228, %cst_88 {dimension_numbers = #tpu.dot_dimension_numbers<[2], [1], [1], [2], [0, 0, 0, 1, 1, 2], [0], [0]>} : vector<2x8x16xbf16>, vector<2x16x8xbf16>, vector<2x8x8xf32> -> vector<2x8x8xf32>
    "tpu.trace_stop"() : () -> ()
    %230 = vector.shape_cast %229 : vector<2x8x8xf32> to vector<16x8xf32>
    %231 = arith.truncf %230 : vector<16x8xf32> to vector<16x8xbf16>
    %232 = vector.extract_strided_slice %151 {offsets = [2, 0, 0], sizes = [1, 8, 32], strides = [1, 1, 1]} : vector<4x8x32xbf16> to vector<1x8x32xbf16>
    %233 = vector.shape_cast %232 : vector<1x8x32xbf16> to vector<8x32xbf16>
    %cst_89 = arith.constant dense<0.000000e+00> : vector<16x32xf32>
    %234 = tpu.matmul %231, %233, %cst_89 {dimension_numbers = #tpu.dot_dimension_numbers<[1], [0], [0], [1], [0, 0, 1, 1], [], []>} : vector<16x8xbf16>, vector<8x32xbf16>, vector<16x32xf32> -> vector<16x32xf32>
    %235 = arith.addf %213, %234 : vector<16x32xf32>
    %236 = vector.extract_strided_slice %166 {offsets = [0, 0, 24], sizes = [2, 8, 8], strides = [1, 1, 1]} : vector<2x8x32xbf16> to vector<2x8x8xbf16>
    %237 = vector.extract_strided_slice %168 {offsets = [0, 0, 24], sizes = [2, 16, 8], strides = [1, 1, 1]} : vector<2x16x32xbf16> to vector<2x16x8xbf16>
    "tpu.trace_start"() <{level = 10 : i32, message = "bqh,bkh->bqk"}> : () -> ()
    %cst_90 = arith.constant dense<0.000000e+00> : vector<2x8x16xf32>
    %238 = tpu.matmul %236, %237, %cst_90 {dimension_numbers = #tpu.dot_dimension_numbers<[2], [2], [1], [1], [0, 0, 0, 1, 1, 1], [0], [0]>} : vector<2x8x8xbf16>, vector<2x16x8xbf16>, vector<2x8x16xf32> -> vector<2x8x16xf32>
    "tpu.trace_stop"() : () -> ()
    %cst_91 = arith.constant dense<0xFF800000> : vector<2x8xf32>
    %239 = vector.multi_reduction <maximumf>, %238, %cst_91 [2] : vector<2x8x16xf32> to vector<2x8xf32>
    %240 = vector.shape_cast %239 : vector<2x8xf32> to vector<2x8x1xf32>
    %241 = vector.broadcast %240 : vector<2x8x1xf32> to vector<2x8x16xf32>
    %242 = arith.subf %238, %241 : vector<2x8x16xf32>
    %243 = math.exp %242 : vector<2x8x16xf32>
    %cst_92 = arith.constant dense<0.000000e+00> : vector<2x8xf32>
    %244 = vector.multi_reduction <add>, %243, %cst_92 [2] : vector<2x8x16xf32> to vector<2x8xf32>
    %245 = vector.shape_cast %244 : vector<2x8xf32> to vector<2x8x1xf32>
    %246 = tpu.reciprocal %245 {approx = true} : vector<2x8x1xf32> -> vector<2x8x1xf32>
    %247 = vector.broadcast %246 : vector<2x8x1xf32> to vector<2x8x16xf32>
    %248 = arith.mulf %243, %247 : vector<2x8x16xf32>
    %249 = arith.truncf %248 : vector<2x8x16xf32> to vector<2x8x16xbf16>
    %250 = vector.extract_strided_slice %170 {offsets = [0, 0, 24], sizes = [2, 16, 8], strides = [1, 1, 1]} : vector<2x16x32xbf16> to vector<2x16x8xbf16>
    "tpu.trace_start"() <{level = 10 : i32, message = "bqk,bkh->bqh"}> : () -> ()
    %cst_93 = arith.constant dense<0.000000e+00> : vector<2x8x8xf32>
    %251 = tpu.matmul %249, %250, %cst_93 {dimension_numbers = #tpu.dot_dimension_numbers<[2], [1], [1], [2], [0, 0, 0, 1, 1, 2], [0], [0]>} : vector<2x8x16xbf16>, vector<2x16x8xbf16>, vector<2x8x8xf32> -> vector<2x8x8xf32>
    "tpu.trace_stop"() : () -> ()
    %252 = vector.shape_cast %251 : vector<2x8x8xf32> to vector<16x8xf32>
    %253 = arith.truncf %252 : vector<16x8xf32> to vector<16x8xbf16>
    %254 = vector.extract_strided_slice %151 {offsets = [3, 0, 0], sizes = [1, 8, 32], strides = [1, 1, 1]} : vector<4x8x32xbf16> to vector<1x8x32xbf16>
    %255 = vector.shape_cast %254 : vector<1x8x32xbf16> to vector<8x32xbf16>
    %cst_94 = arith.constant dense<0.000000e+00> : vector<16x32xf32>
    %256 = tpu.matmul %253, %255, %cst_94 {dimension_numbers = #tpu.dot_dimension_numbers<[1], [0], [0], [1], [0, 0, 1, 1], [], []>} : vector<16x8xbf16>, vector<8x32xbf16>, vector<16x32xf32> -> vector<16x32xf32>
    %257 = arith.addf %235, %256 : vector<16x32xf32>
    %258 = vector.broadcast %152 : vector<1x32xf32> to vector<16x32xf32>
    %259 = arith.addf %257, %258 : vector<16x32xf32>
    %260 = arith.addf %142, %259 : vector<16x32xf32>
    %c0_95 = arith.constant 0 : index
    %c0_96 = arith.constant 0 : index
    %261 = vector.load %arg26[%c0_95, %c0_96] : memref<1x32xf32, #tpu.memory_space<vmem>>, vector<1x32xf32>
    %c0_97 = arith.constant 0 : index
    %c0_98 = arith.constant 0 : index
    %262 = vector.load %arg27[%c0_97, %c0_98] : memref<1x32xf32, #tpu.memory_space<vmem>>, vector<1x32xf32>
    %cst_99 = arith.constant dense<0.000000e+00> : vector<16xf32>
    %263 = vector.multi_reduction <add>, %260, %cst_99 [1] : vector<16x32xf32> to vector<16xf32>
    %264 = vector.shape_cast %263 : vector<16xf32> to vector<16x1xf32>
    %cst_100 = arith.constant 3.200000e+01 : f32
    %265 = vector.broadcast %cst_100 : f32 to vector<16x1xf32>
    %266 = arith.divf %264, %265 : vector<16x1xf32>
    %267 = vector.broadcast %266 : vector<16x1xf32> to vector<16x32xf32>
    %268 = arith.subf %260, %267 : vector<16x32xf32>
    %269 = arith.mulf %268, %268 : vector<16x32xf32>
    %cst_101 = arith.constant dense<0.000000e+00> : vector<16xf32>
    %270 = vector.multi_reduction <add>, %269, %cst_101 [1] : vector<16x32xf32> to vector<16xf32>
    %271 = vector.shape_cast %270 : vector<16xf32> to vector<16x1xf32>
    %cst_102 = arith.constant 3.200000e+01 : f32
    %272 = vector.broadcast %cst_102 : f32 to vector<16x1xf32>
    %273 = arith.divf %271, %272 : vector<16x1xf32>
    %cst_103 = arith.constant 9.99999974E-6 : f32
    %274 = vector.broadcast %cst_103 : f32 to vector<16x1xf32>
    %275 = arith.addf %273, %274 : vector<16x1xf32>
    %276 = math.rsqrt %275 : vector<16x1xf32>
    %277 = vector.broadcast %276 : vector<16x1xf32> to vector<16x32xf32>
    %278 = arith.mulf %268, %277 : vector<16x32xf32>
    %279 = vector.broadcast %261 : vector<1x32xf32> to vector<16x32xf32>
    %280 = arith.mulf %278, %279 : vector<16x32xf32>
    %281 = vector.broadcast %262 : vector<1x32xf32> to vector<16x32xf32>
    %282 = arith.addf %280, %281 : vector<16x32xf32>
    %283 = arith.truncf %282 : vector<16x32xf32> to vector<16x32xbf16>
    %c0_104 = arith.constant 0 : index
    %c0_105 = arith.constant 0 : index
    %284 = vector.load %arg20[%c0_104, %c0_105] : memref<32x64xbf16, #tpu.memory_space<vmem>>, vector<32x64xbf16>
    %cst_106 = arith.constant dense<0.000000e+00> : vector<16x64xf32>
    %285 = tpu.matmul %283, %284, %cst_106 {dimension_numbers = #tpu.dot_dimension_numbers<[1], [0], [0], [1], [0, 0, 1, 1], [], []>} : vector<16x32xbf16>, vector<32x64xbf16>, vector<16x64xf32> -> vector<16x64xf32>
    %c0_107 = arith.constant 0 : index
    %c0_108 = arith.constant 0 : index
    %286 = vector.load %arg21[%c0_107, %c0_108] : memref<1x64xf32, #tpu.memory_space<vmem>>, vector<1x64xf32>
    %287 = vector.broadcast %286 : vector<1x64xf32> to vector<16x64xf32>
    %288 = arith.addf %285, %287 : vector<16x64xf32>
    %cst_109 = arith.constant 0.000000e+00 : f32
    %289 = vector.broadcast %cst_109 : f32 to vector<16x64xf32>
    %290 = arith.maximumf %288, %289 : vector<16x64xf32>
    %291 = arith.truncf %290 : vector<16x64xf32> to vector<16x64xbf16>
    %c0_110 = arith.constant 0 : index
    %c0_111 = arith.constant 0 : index
    %292 = vector.load %arg22[%c0_110, %c0_111] : memref<64x32xbf16, #tpu.memory_space<vmem>>, vector<64x32xbf16>
    %cst_112 = arith.constant dense<0.000000e+00> : vector<16x32xf32>
    %293 = tpu.matmul %291, %292, %cst_112 {dimension_numbers = #tpu.dot_dimension_numbers<[1], [0], [0], [1], [0, 0, 1, 1], [], []>} : vector<16x64xbf16>, vector<64x32xbf16>, vector<16x32xf32> -> vector<16x32xf32>
    %c0_113 = arith.constant 0 : index
    %c0_114 = arith.constant 0 : index
    %294 = vector.load %arg23[%c0_113, %c0_114] : memref<1x32xf32, #tpu.memory_space<vmem>>, vector<1x32xf32>
    %295 = vector.broadcast %294 : vector<1x32xf32> to vector<16x32xf32>
    %296 = arith.addf %293, %295 : vector<16x32xf32>
    %297 = arith.addf %282, %296 : vector<16x32xf32>
    %c0_115 = arith.constant 0 : index
    %c0_116 = arith.constant 0 : index
    %298 = vector.load %arg28[%c0_115, %c0_116] : memref<1x32xf32, #tpu.memory_space<vmem>>, vector<1x32xf32>
    %c0_117 = arith.constant 0 : index
    %c0_118 = arith.constant 0 : index
    %299 = vector.load %arg29[%c0_117, %c0_118] : memref<1x32xf32, #tpu.memory_space<vmem>>, vector<1x32xf32>
    %cst_119 = arith.constant dense<0.000000e+00> : vector<16xf32>
    %300 = vector.multi_reduction <add>, %297, %cst_119 [1] : vector<16x32xf32> to vector<16xf32>
    %301 = vector.shape_cast %300 : vector<16xf32> to vector<16x1xf32>
    %cst_120 = arith.constant 3.200000e+01 : f32
    %302 = vector.broadcast %cst_120 : f32 to vector<16x1xf32>
    %303 = arith.divf %301, %302 : vector<16x1xf32>
    %304 = vector.broadcast %303 : vector<16x1xf32> to vector<16x32xf32>
    %305 = arith.subf %297, %304 : vector<16x32xf32>
    %306 = arith.mulf %305, %305 : vector<16x32xf32>
    %cst_121 = arith.constant dense<0.000000e+00> : vector<16xf32>
    %307 = vector.multi_reduction <add>, %306, %cst_121 [1] : vector<16x32xf32> to vector<16xf32>
    %308 = vector.shape_cast %307 : vector<16xf32> to vector<16x1xf32>
    %cst_122 = arith.constant 3.200000e+01 : f32
    %309 = vector.broadcast %cst_122 : f32 to vector<16x1xf32>
    %310 = arith.divf %308, %309 : vector<16x1xf32>
    %cst_123 = arith.constant 9.99999974E-6 : f32
    %311 = vector.broadcast %cst_123 : f32 to vector<16x1xf32>
    %312 = arith.addf %310, %311 : vector<16x1xf32>
    %313 = math.rsqrt %312 : vector<16x1xf32>
    %314 = vector.broadcast %313 : vector<16x1xf32> to vector<16x32xf32>
    %315 = arith.mulf %305, %314 : vector<16x32xf32>
    %316 = vector.broadcast %298 : vector<1x32xf32> to vector<16x32xf32>
    %317 = arith.mulf %315, %316 : vector<16x32xf32>
    %318 = vector.broadcast %299 : vector<1x32xf32> to vector<16x32xf32>
    %319 = arith.addf %317, %318 : vector<16x32xf32>
    %c0_124 = arith.constant 0 : index
    %c0_125 = arith.constant 0 : index
    %320 = vector.load %arg30[%c0_124, %c0_125] : memref<16x32xf32, #tpu.memory_space<vmem>>, vector<16x32xf32>
    tpu.vector_store %arg30[%c0_124, %c0_125], %319 {strides = array<i32>} : memref<16x32xf32, #tpu.memory_space<vmem>>, vector<16x32xf32>,
    return
  }
}

</mosaic_0001>

<bundles_post_ra>
// kernel: tpu_custom_call.1
= control target key start
LH: loop header
LB: loop body
LE: loop exit
PB: predicated region body
PF: predicated region fallthrough
CT: control target
= control target key end

     0   :  { %s4338_s6 = smov 1   ;;  %s4339_s10 = smov 2   ;;  %s5078_s0 = inlined_call_operand.smem [shape: u32[31], index: -1, kind: input, shape index: {}] }
   0x1   :  { %s4403_s5 = sld [smem:[%s5078_s0]]   ;;  %s4340_s14 = smov 3  }
   0x2   :  { %s4408_s9 = sld [smem:[%s5078_s0 + %s4338_s6]]   ;;  %s4341_s18 = smov 4  }
   0x3   :  { %s4413_s13 = sld [smem:[%s5078_s0 + %s4339_s10]]   ;;  %s4342_s22 = smov 5  }
   0x4   :  { %s4418_s17 = sld [smem:[%s5078_s0 + %s4340_s14]]   ;;  %s4343_s26 = smov 6  }
   0x5   :  { %s4423_s21 = sld [smem:[%s5078_s0 + %s4341_s18]]   ;;  %s4344_s30 = smov 7  }
   0x6   :  { %s4428_s25 = sld [smem:[%s5078_s0 + %s4342_s22]]   ;;  %s4345_s4 = smov 8  }
   0x7   :  { %5083 = sst [smem:[#allocation40_spill]] %s4403_s5  ;;  %s4346_s10 = smov 9  }
   0x8   :  { %s4433_s29 = sld [smem:[%s5078_s0 + %s4343_s26]]   ;;  %s4347_s15 = smov 10  }
   0x9   :  { %5084 = sst [smem:[#allocation41_spill]] %s4413_s13  ;;  %s4348_s20 = smov 11  }
   0xa   :  { %s4438_s3 = sld [smem:[%s5078_s0 + %s4344_s30]]   ;;  %s4349_s26 = smov 12  }
   0xb   :  { %s4443_s8 = sld [smem:[%s5078_s0 + %s4345_s4]]   ;;  %s4350_s1 = smov 13  }
   0xc   :  { %s4448_s14 = sld [smem:[%s5078_s0 + %s4346_s10]]   ;;  %s4351_s7 = smov 14  }
   0xd   :  { %s4453_s19 = sld [smem:[%s5078_s0 + %s4347_s15]]   ;;  %s4352_s15 = smov 15  }
   0xe   :  { %s4458_s24 = sld [smem:[%s5078_s0 + %s4348_s20]]   ;;  %s4353_s22 = smov 16  }
   0xf   :  { %s4463_s30 = sld [smem:[%s5078_s0 + %s4349_s26]]   ;;  %s4354_s28 = smov 17  }
  0x10   :  { %s4468_s6 = sld [smem:[%s5078_s0 + %s4350_s1]]  }
  0x11   :  { %s4473_s12 = sld [smem:[%s5078_s0 + %s4351_s7]]   ;;  %s4355_s7 = smov 18  }
  0x12   :  { %s4478_s20 = sld [smem:[%s5078_s0 + %s4352_s15]]   ;;  %s4356_s15 = smov 19  }
  0x13   :  { %5085 = sst [smem:[#allocation42_spill]] %s4453_s19 }
  0x14   :  { %s4483_s27 = sld [smem:[%s5078_s0 + %s4353_s22]]   ;;  %s4357_s22 = smov 20  }
  0x15   :  { %s4488_s4 = sld [smem:[%s5078_s0 + %s4354_s28]]   ;;  %s4358_s28 = smov 21  }
  0x16   :  { %s4493_s13 = sld [smem:[%s5078_s0 + %s4355_s7]]   ;;  %s4359_s7 = smov 22  }
  0x17   :  { %s4498_s19 = sld [smem:[%s5078_s0 + %s4356_s15]]   ;;  %s4360_s15 = smov 23  }
  0x18   :  { %5086 = sst [smem:[#allocation43_spill]] %s4478_s20 }
  0x19   :  { %s4503_s5 = sld [smem:[%s5078_s0 + %s4357_s22]]   ;;  %s4361_s22 = smov 24  }
  0x1a   :  { %s4513_s20 = sld [smem:[%s5078_s0 + %s4359_s7]]   ;;  %s4363_s7 = smov 26  }
  0x1b   :  { %5087 = sst [smem:[#allocation44_spill]] %s4488_s4 }
  0x1c   :  { %s4508_s4 = sld [smem:[%s5078_s0 + %s4358_s28]]   ;;  %s4362_s28 = smov 25  }
  0x1d   :  { %5088 = sst [smem:[#allocation45_spill]] %s4498_s19 }
  0x1e   :  { %s4518_s19 = sld [smem:[%s5078_s0 + %s4360_s15]]   ;;  %s4364_s15 = smov 27  }
  0x1f   :  { %5089 = sst [smem:[#allocation46_spill]] %s4503_s5 }
  0x20   :  { %5091 = sst [smem:[#allocation48_spill]] %s4513_s20 }
  0x21   :  { %s4523_s5 = sld [smem:[%s5078_s0 + %s4361_s22]]   ;;  %s4365_s22 = smov 28  }
  0x22   :  { %5090 = sst [smem:[#allocation47_spill]] %s4508_s4 }
  0x23   :  { %s4528_s4 = sld [smem:[%s5078_s0 + %s4362_s28]]   ;;  %s4366_s28 = smov 29  }
  0x24   :  { %5092 = sst [smem:[#allocation49_spill]] %s4518_s19 }
  0x25   :  { %s4533_s20 = sld [smem:[%s5078_s0 + %s4363_s7]]   ;;  %s4367_s7 = smov 30  }
  0x26   :  { %s4538_s19 = sld [smem:[%s5078_s0 + %s4364_s15]]  }
  0x27   :  { %5093 = sst [smem:[#allocation50_spill]] %s4523_s5 }
  0x28   :  { %s4543_s5 = sld [smem:[%s5078_s0 + %s4365_s22]]  }
  0x29   :  { %5094 = sst [smem:[#allocation51_spill]] %s4528_s4 }
  0x2a   :  { %s4548_s4 = sld [smem:[%s5078_s0 + %s4366_s28]]  }
  0x2b   :  { %5095 = sst [smem:[#allocation52_spill]] %s4533_s20 }
  0x2c   :  { %s4553_s20 = sld [smem:[%s5078_s0 + %s4367_s7]]  }
  0x2d   :  { %66 = vsyncpa [#allocation3], 0 }
  0x2e   :  { %67 = vsyncpa [#allocation6], 0 }
  0x2f   :  { %68 = vsyncpa [#allocation9], 0 }
  0x30   :  { %69 = vsyncpa [#allocation12], 0 }
  0x31   :  { %70 = vsyncpa [#allocation15], 0 }
  0x32   :  { %71 = vsyncpa [#allocation18], 0 }
  0x33   :  { %72 = vsyncpa [#allocation21], 0 }
  0x34   :  { %73 = vsyncpa [#allocation24], 0 }
  0x35   :  { %74 = vsyncpa [#allocation27], 0 }
  0x36   :  { %75 = vsyncpa [#allocation4], 0  ;;  %s4368_s15 = smov [#allocation5]   ;;  %s4369_s18 = smov [#allocation8]  }
  0x37   :  { %s97_s16 = sshll.u32 %s4368_s15, 4  ;;  %s122_s22 = sshll.u32 %s4369_s18, 4  ;;  %s98_s16 = int_to_ptr.vmem [resolvable:$true] %s97_s16  ;;  %s123_s22 = int_to_ptr.vmem [resolvable:$true] %s122_s22 }
  0x38   :  { %s3966_s23 = scalar_lea.vmem %s98_s16, 512  ;;  %p3971_p1 = scmp.lt.s32.totalorder %s98_s16, %s98_s16 }
  0x39   :  { %p3967_p0 = scmp.ne.s32.totalorder %s98_s16, %s3966_s23  ;;  %p3972_p2 = scmp.lt.s32.totalorder %s3966_s23, %s3966_s23 }
  0x3b   :  { %p3973_p3 = por %p3972_p2, %p3971_p1 }
  0x3d   :  { %p3974_p4 = pnand %p3973_p3, %p3967_p0 }
  0x3f   :  { %3977 = shalt.err (!%p3974_p4)
}
  0x40   :  { %s4370_s0 = smov 128   ;;  %s4371_s26 = smov 8  }
  0x41   :  { %103 = dma.hbm_to_vmem [thread:$0]  %s4418_s17, 512, %s98_s16, [#allocation6], %s4370_s0, %s4370_s0, %s4371_s26  }
  0x42   :  { %s3986_s28 = scalar_lea.vmem %s123_s22, 16  ;;  %s3990_s1 = scalar_lea.vmem %s123_s22, 32 }
  0x43   :  { %p3987_p5 = scmp.ne.s32.totalorder %s123_s22, %s3986_s28  ;;  %p3991_p6 = scmp.lt.s32.totalorder %s123_s22, %s123_s22 }
  0x44   :  { %p3992_p7 = scmp.lt.s32.totalorder %s3990_s1, %s3986_s28 }
  0x46   :  { %p3993_p8 = por %p3992_p7, %p3991_p6 }
  0x48   :  { %p3994_p9 = pnand %p3993_p8, %p3987_p5 }
  0x4a   :  { %3997 = shalt.err (!%p3994_p9)
}
  0x4b   :  { %125 = dma.hbm_to_vmem [thread:$0]  %s4428_s25, 16, %s123_s22, [#allocation9]  }
  0x4c   :  { %s4372_s2 = smov [#allocation11]   ;;  %s4373_s10 = smov [#allocation14]  }
  0x4d   :  { %s144_s7 = sshll.u32 %s4372_s2, 4  ;;  %s166_s11 = sshll.u32 %s4373_s10, 4  ;;  %s145_s7 = int_to_ptr.vmem [resolvable:$true] %s144_s7  ;;  %s167_s11 = int_to_ptr.vmem [resolvable:$true] %s166_s11 }
  0x4e   :  { %s4006_s15 = scalar_lea.vmem %s145_s7, 16  ;;  %s4010_s18 = scalar_lea.vmem %s145_s7, 32 }
  0x4f   :  { %p4007_p10 = scmp.ne.s32.totalorder %s145_s7, %s4006_s15  ;;  %p4011_p11 = scmp.lt.s32.totalorder %s145_s7, %s145_s7 }
  0x50   :  { %p4012_p12 = scmp.lt.s32.totalorder %s4010_s18, %s4006_s15 }
  0x52   :  { %p4013_p13 = por %p4012_p12, %p4011_p11 }
  0x54   :  { %p4014_p0 = pnand %p4013_p13, %p4007_p10 }
  0x56   :  { %4017 = shalt.err (!%p4014_p0)
}
  0x57   :  { %147 = dma.hbm_to_vmem [thread:$0]  %s4438_s3, 16, %s145_s7, [#allocation12]  }
  0x58   :  { %s4026_s17 = scalar_lea.vmem %s167_s11, 16  ;;  %s4030_s16 = scalar_lea.vmem %s167_s11, 32 }
  0x59   :  { %p4027_p1 = scmp.ne.s32.totalorder %s167_s11, %s4026_s17  ;;  %p4031_p2 = scmp.lt.s32.totalorder %s167_s11, %s167_s11 }
  0x5a   :  { %p4032_p3 = scmp.lt.s32.totalorder %s4030_s16, %s4026_s17 }
  0x5c   :  { %p4033_p4 = por %p4032_p3, %p4031_p2 }
  0x5e   :  { %p4034_p5 = pnand %p4033_p4, %p4027_p1 }
  0x60   :  { %4037 = shalt.err (!%p4034_p5)
}
  0x61   :  { %169 = dma.hbm_to_vmem [thread:$0]  %s4448_s14, 16, %s167_s11, [#allocation15]  }
  0x62   :  { %s4374_s25 = smov [#allocation17]   ;;  %s4375_s23 = smov [#allocation20]  }
  0x63   :  { %s187_s22 = sshll.u32 %s4374_s25, 4  ;;  %s209_s28 = sshll.u32 %s4375_s23, 4  ;;  %s188_s22 = int_to_ptr.vmem [resolvable:$true] %s187_s22  ;;  %s210_s28 = int_to_ptr.vmem [resolvable:$true] %s209_s28 }
  0x64   :  { %s4046_s1 = scalar_lea.vmem %s188_s22, 256  ;;  %p4051_p7 = scmp.lt.s32.totalorder %s188_s22, %s188_s22 }
  0x65   :  { %p4047_p6 = scmp.ne.s32.totalorder %s188_s22, %s4046_s1  ;;  %p4052_p8 = scmp.lt.s32.totalorder %s4046_s1, %s4046_s1 }
  0x67   :  { %p4053_p9 = por %p4052_p8, %p4051_p7 }
  0x69   :  { %p4054_p10 = pnand %p4053_p9, %p4047_p6 }
  0x6b   :  { %4057 = shalt.err (!%p4054_p10)
}
  0x6c   :  { %s4376_s3 = smov 64   ;;  %s4377_s2 = smov 4  }
  0x6d   :  { %193 = dma.hbm_to_vmem [thread:$0]  %s4463_s30, 256, %s188_s22, [#allocation18], %s4376_s3, %s4376_s3, %s4377_s2  }
  0x6e   :  { %s4066_s14 = scalar_lea.vmem %s210_s28, 256  ;;  %p4071_p12 = scmp.lt.s32.totalorder %s210_s28, %s210_s28 }
  0x6f   :  { %p4067_p11 = scmp.ne.s32.totalorder %s210_s28, %s4066_s14  ;;  %p4072_p13 = scmp.lt.s32.totalorder %s4066_s14, %s4066_s14 }
  0x71   :  { %p4073_p0 = por %p4072_p13, %p4071_p12 }
  0x73   :  { %p4074_p1 = pnand %p4073_p0, %p4067_p11 }
  0x75   :  { %4077 = shalt.err (!%p4074_p1)
}
  0x76   :  { %215 = dma.hbm_to_vmem [thread:$0]  %s4473_s12, 256, %s210_s28, [#allocation21], %s4376_s3, %s4376_s3, %s4377_s2  }
  0x77   :  { %s4378_s7 = smov [#allocation23]   ;;  %s4379_s11 = smov [#allocation26]  }
  0x78   :  { %s231_s10 = sshll.u32 %s4378_s7, 4  ;;  %s253_s15 = sshll.u32 %s4379_s11, 4  ;;  %s232_s10 = int_to_ptr.vmem [resolvable:$true] %s231_s10  ;;  %s254_s15 = int_to_ptr.vmem [resolvable:$true] %s253_s15 }
  0x79   :  { %s4086_s18 = scalar_lea.vmem %s232_s10, 256  ;;  %p4091_p3 = scmp.lt.s32.totalorder %s232_s10, %s232_s10 }
  0x7a   :  { %p4087_p2 = scmp.ne.s32.totalorder %s232_s10, %s4086_s18  ;;  %p4092_p4 = scmp.lt.s32.totalorder %s4086_s18, %s4086_s18 }
  0x7c   :  { %p4093_p5 = por %p4092_p4, %p4091_p3 }
  0x7e   :  { %p4094_p6 = pnand %p4093_p5, %p4087_p2 }
  0x80   :  { %4097 = shalt.err (!%p4094_p6)
}
  0x81   :  { %237 = dma.hbm_to_vmem [thread:$0]  %s4483_s27, 256, %s232_s10, [#allocation24], %s4376_s3, %s4376_s3, %s4377_s2  }
  0x82   :  { %s4106_s30 = scalar_lea.vmem %s254_s15, 256  ;;  %p4111_p8 = scmp.lt.s32.totalorder %s254_s15, %s254_s15 }
  0x83   :  { %p4107_p7 = scmp.ne.s32.totalorder %s254_s15, %s4106_s30  ;;  %p4112_p9 = scmp.lt.s32.totalorder %s4106_s30, %s4106_s30 }
  0x85   :  { %p4113_p10 = por %p4112_p9, %p4111_p8 }
  0x87   :  { %p4114_p11 = pnand %p4113_p10, %p4107_p7 }
  0x89   :  { %4117 = shalt.err (!%p4114_p11)
}
  0x8a   :  { %259 = dma.hbm_to_vmem [thread:$0]  %s4493_s13, 256, %s254_s15, [#allocation27], %s4376_s3, %s4376_s3, %s4377_s2  }
  0x8b   :  { %s4380_s12 = smov [#allocation2]   ;;  %s4381_s16 = smov [#allocation7]  }
  0x8c   :  { %s83_s17 = sshll.u32 %s4380_s12, 4  ;;  %s109_s25 = sshll.u32 %s4381_s16, 4  ;;  %s84_s17 = int_to_ptr.vmem [resolvable:$true] %s83_s17  ;;  %s110_s25 = int_to_ptr.vmem [resolvable:$true] %s109_s25 }
  0x8d   :  { %s4126_s22 = scalar_lea.vmem %s84_s17, 256  ;;  %p4131_p13 = scmp.lt.s32.totalorder %s84_s17, %s84_s17 }
  0x8e   :  { %p4127_p12 = scmp.ne.s32.totalorder %s84_s17, %s4126_s22  ;;  %p4132_p0 = scmp.lt.s32.totalorder %s4126_s22, %s4126_s22 }
  0x90   :  { %p4133_p1 = por %p4132_p0, %p4131_p13 }
  0x92   :  { %p4134_p2 = pnand %p4133_p1, %p4127_p12 }
  0x94   :  { %4137 = shalt.err (!%p4134_p2)
}
  0x95   :  { %89 = dma.hbm_to_vmem [thread:$0]  %s4408_s9, 256, %s84_s17, [#allocation3], %s4370_s0, %s4370_s0, %s4371_s26  }
  0x96   :  { %s4146_s27 = scalar_lea.vmem %s110_s25, 256  ;;  %p4151_p4 = scmp.lt.s32.totalorder %s110_s25, %s110_s25 }
  0x97   :  { %p4147_p3 = scmp.ne.s32.totalorder %s110_s25, %s4146_s27  ;;  %p4152_p5 = scmp.lt.s32.totalorder %s4146_s27, %s4146_s27 }
  0x99   :  { %p4153_p6 = por %p4152_p5, %p4151_p4 }
  0x9b   :  { %p4154_p7 = pnand %p4153_p6, %p4147_p3 }
  0x9d   :  { %4157 = shalt.err (!%p4154_p7)
}
  0x9e   :  { %115 = dma.hbm_to_vmem [thread:$0]  %s4423_s21, 256, %s110_s25, [#allocation6], %s4376_s3, %s4376_s3, %s4377_s2  }
  0x9f   :  { %s4382_s13 = smov [#allocation10]   ;;  %s4383_s28 = smov [#allocation13]  }
  0xa0   :  { %s131_s23 = sshll.u32 %s4382_s13, 4  ;;  %s153_s1 = sshll.u32 %s4383_s28, 4  ;;  %s132_s23 = int_to_ptr.vmem [resolvable:$true] %s131_s23  ;;  %s154_s1 = int_to_ptr.vmem [resolvable:$true] %s153_s1 }
  0xa1   :  { %s4166_s14 = scalar_lea.vmem %s132_s23, 256  ;;  %p4171_p9 = scmp.lt.s32.totalorder %s132_s23, %s132_s23 }
  0xa2   :  { %p4167_p8 = scmp.ne.s32.totalorder %s132_s23, %s4166_s14  ;;  %p4172_p10 = scmp.lt.s32.totalorder %s4166_s14, %s4166_s14 }
  0xa4   :  { %p4173_p11 = por %p4172_p10, %p4171_p9 }
  0xa6   :  { %p4174_p12 = pnand %p4173_p11, %p4167_p8 }
  0xa8   :  { %4177 = shalt.err (!%p4174_p12)
}
  0xa9   :  { %137 = dma.hbm_to_vmem [thread:$0]  %s4433_s29, 256, %s132_s23, [#allocation9], %s4376_s3, %s4376_s3, %s4377_s2  }
  0xaa   :  { %s4186_s9 = scalar_lea.vmem %s154_s1, 256  ;;  %p4191_p0 = scmp.lt.s32.totalorder %s154_s1, %s154_s1 }
  0xab   :  { %p4187_p13 = scmp.ne.s32.totalorder %s154_s1, %s4186_s9  ;;  %p4192_p1 = scmp.lt.s32.totalorder %s4186_s9, %s4186_s9 }
  0xad   :  { %p4193_p2 = por %p4192_p1, %p4191_p0 }
  0xaf   :  { %p4194_p3 = pnand %p4193_p2, %p4187_p13 }
  0xb1   :  { %4197 = shalt.err (!%p4194_p3)
}
  0xb2   :  { %159 = dma.hbm_to_vmem [thread:$0]  %s4443_s8, 256, %s154_s1, [#allocation12], %s4376_s3, %s4376_s3, %s4377_s2  }
  0xb3   :  { %s4384_s21 = smov [#allocation16]   ;;  %s4385_s10 = smov [#allocation19]  }
  0xb4   :  { %s178_s7 = sshll.u32 %s4384_s21, 4  ;;  %s200_s11 = sshll.u32 %s4385_s10, 4  ;;  %s179_s7 = int_to_ptr.vmem [resolvable:$true] %s178_s7  ;;  %s201_s11 = int_to_ptr.vmem [resolvable:$true] %s200_s11 }
  0xb5   :  { %s4206_s15 = scalar_lea.vmem %s179_s7, 16  ;;  %s4210_s29 = scalar_lea.vmem %s179_s7, 32 }
  0xb6   :  { %p4207_p4 = scmp.ne.s32.totalorder %s179_s7, %s4206_s15  ;;  %p4211_p5 = scmp.lt.s32.totalorder %s179_s7, %s179_s7 }
  0xb7   :  { %p4212_p6 = scmp.lt.s32.totalorder %s4210_s29, %s4206_s15 }
  0xb9   :  { %p4213_p7 = por %p4212_p6, %p4211_p5 }
  0xbb   :  { %p4214_p8 = pnand %p4213_p7, %p4207_p4 }
  0xbd   :  { %4217 = shalt.err (!%p4214_p8)
}
  0xbe   :  { %181 = dma.hbm_to_vmem [thread:$0]  %s4458_s24, 16, %s179_s7, [#allocation15]  }
  0xbf   :  { %s4226_s18 = scalar_lea.vmem %s201_s11, 16  ;;  %s4230_s30 = scalar_lea.vmem %s201_s11, 32 }
  0xc0   :  { %p4227_p9 = scmp.ne.s32.totalorder %s201_s11, %s4226_s18  ;;  %p4231_p10 = scmp.lt.s32.totalorder %s201_s11, %s201_s11 }
  0xc1   :  { %p4232_p11 = scmp.lt.s32.totalorder %s4230_s30, %s4226_s18 }
  0xc3   :  { %p4233_p12 = por %p4232_p11, %p4231_p10 }
  0xc5   :  { %p4234_p13 = pnand %p4233_p12, %p4227_p9 }
  0xc7   :  { %4237 = shalt.err (!%p4234_p13)
}
  0xc8   :  { %203 = dma.hbm_to_vmem [thread:$0]  %s4468_s6, 16, %s201_s11, [#allocation18]  }
  0xc9   :  { %s4386_s8 = smov [#allocation22]   ;;  %s4387_s17 = smov [#allocation25]  }
  0xca   :  { %s222_s12 = sshll.u32 %s4386_s8, 4  ;;  %s244_s16 = sshll.u32 %s4387_s17, 4  ;;  %s223_s12 = int_to_ptr.vmem [resolvable:$true] %s222_s12  ;;  %s245_s16 = int_to_ptr.vmem [resolvable:$true] %s244_s16 }
  0xcb   :  { %s4246_s25 = scalar_lea.vmem %s223_s12, 16  ;;  %s4250_s22 = scalar_lea.vmem %s223_s12, 32 }
  0xcc   :  { %p4247_p0 = scmp.ne.s32.totalorder %s223_s12, %s4246_s25  ;;  %p4251_p1 = scmp.lt.s32.totalorder %s223_s12, %s223_s12 }
  0xcd   :  { %p4252_p2 = scmp.lt.s32.totalorder %s4250_s22, %s4246_s25 }
  0xcf   :  { %p4253_p3 = por %p4252_p2, %p4251_p1 }
  0xd1   :  { %p4254_p4 = pnand %p4253_p3, %p4247_p0 }
  0xd3   :  { %4257 = shalt.err (!%p4254_p4)
}
  0xd4   :  { %s5096_s24 = sld [smem:[#allocation43_spill]]  ;;  %s4266_s27 = scalar_lea.vmem %s245_s16, 16 }
  0xd5   :  { %p4267_p5 = scmp.ne.s32.totalorder %s245_s16, %s4266_s27  ;;  %s4270_s13 = scalar_lea.vmem %s245_s16, 32 }
  0xd6   :  { %p4271_p6 = scmp.lt.s32.totalorder %s245_s16, %s245_s16  ;;  %p4272_p7 = scmp.lt.s32.totalorder %s4270_s13, %s4266_s27 }
  0xd8   :  { %p4273_p8 = por %p4272_p7, %p4271_p6 }
  0xda   :  { %225 = dma.hbm_to_vmem [thread:$0]  %s5096_s24, 16, %s223_s12, [#allocation21]  }
  0xdb   :  { %p4274_p9 = pnand %p4273_p8, %p4267_p5 }
  0xdd   :  { %4277 = shalt.err (!%p4274_p9)
}
  0xde   :  { %s5097_s6 = sld [smem:[#allocation44_spill]]  ;;  %s4388_s23 = smov [#allocation28]  }
  0xdf   :  { %s267_s28 = sshll.u32 %s4388_s23, 4  ;;  %s268_s28 = int_to_ptr.vmem [resolvable:$true] %s267_s28 }
  0xe0   :  { %s4286_s1 = scalar_lea.vmem %s268_s28, 256  ;;  %p4291_p11 = scmp.lt.s32.totalorder %s268_s28, %s268_s28 }
  0xe1   :  { %p4287_p10 = scmp.ne.s32.totalorder %s268_s28, %s4286_s1  ;;  %p4292_p12 = scmp.lt.s32.totalorder %s4286_s1, %s4286_s1 }
  0xe3   :  { %p4293_p13 = por %p4292_p12, %p4291_p11 }
  0xe4   :  { %247 = dma.hbm_to_vmem [thread:$0]  %s5097_s6, 16, %s245_s16, [#allocation24]  }
  0xe5   :  { %p4294_p0 = pnand %p4293_p13, %p4287_p10 }
  0xe7   :  { %4297 = shalt.err (!%p4294_p0)
}
  0xe8   :  { %s5098_s14 = sld [smem:[#allocation46_spill]] }
  0xee   :  { %273 = dma.hbm_to_vmem [thread:$0]  %s5098_s14, 256, %s268_s28, [#allocation27], %s4376_s3, %s4376_s3, %s4377_s2  }
  0xef   :  { %4318 = dma.done.wait [#allocation3], 256  }
  0xf0   :  { %4319 = vsyncadd [#allocation3], 4294967040 }
  0xf1   :  { %4320 = dma.done.wait [#allocation6], 768  }
  0xf2   :  { %4321 = vsyncadd [#allocation6], 4294966528 }
  0xf3   :  { %4322 = dma.done.wait [#allocation9], 272  }
  0xf4   :  { %4323 = vsyncadd [#allocation9], 4294967024 }
  0xf5   :  { %4324 = dma.done.wait [#allocation12], 272  }
  0xf6   :  { %4325 = vsyncadd [#allocation12], 4294967024 }
  0xf7   :  { %4326 = dma.done.wait [#allocation15], 32  }
  0xf8   :  { %4327 = vsyncadd [#allocation15], 4294967264 }
  0xf9   :  { %4328 = dma.done.wait [#allocation18], 272  }
  0xfa   :  { %4329 = vsyncadd [#allocation18], 4294967024 }
  0xfb   :  { %4330 = dma.done.wait [#allocation21], 272  }
  0xfc   :  { %4331 = vsyncadd [#allocation21], 4294967024 }
  0xfd   :  { %4332 = dma.done.wait [#allocation24], 272  }
  0xfe   :  { %4333 = vsyncadd [#allocation24], 4294967024 }
  0xff   :  { %4334 = dma.done.wait [#allocation27], 512  }
 0x100   :  { %4335 = vsyncadd [#allocation27], 4294966784  ;;  %s5099_s9 = sld [smem:[#allocation40_spill]]  ;;  %v4389_v0 = vmov 0.0   ;;  %vm4390_vm0 = vmmov 0   ;;  %v3864_v1 = vld [vmem:[#allocation10 + $0x8] sm:$0xff]  }
 0x101   :  { %3507 = vmatprep.subr.bf16.mxu1 %v4389_v0  ;;  %3499 = vmatprep.subr.bf16.mxu0 %v4389_v0  ;;  %v3865_v2 = vld [vmem:[#allocation7 + $0x8] sm:$0xff]   ;;  %v3866_v3 = vld [vmem:[#allocation10] sm:$0xff]   ;;  %v3867_v4 = vld [vmem:[#allocation7] sm:$0xff]   ;;  %vm398_vm1 = vcmask 261120   ;;  %vm570_vm2 = vcmask 64512   ;;  %s4391_s3 = smov 120  }
 0x102   :  { %3511 = vmatprep.mubr.msk.bf16.mxu1 %vm4390_vm0, %v4389_v0  ;;  %3503 = vmatprep.mubr.msk.bf16.mxu0 %vm4390_vm0, %v4389_v0  ;;  %v4616_v7 = vld [vmem:[#allocation2] sm:$0xff]  ;;  %v4618_v8 = vld [vmem:[#allocation2 + $0x8] sm:$0xff]  ;;  %v3869_v13 = vld [vmem:[#allocation13] sm:$0xff]   ;;  %vm690_vm3 = vcmask 1043456   ;;  %s4392_s2 = smov 112   ;;  %s5100_s21 = sld [smem:[#allocation42_spill]] }
 0x103   :  { %3508 = vmatpush3.bf16.msra.mxu1 %v3864_v1  ;;  %3500 = vmatpush3.bf16.msra.mxu0 %v3865_v2  ;;  %v3868_v11 = vld [vmem:[#allocation13 + $0x8] sm:$0xff]   ;;  %v3311_v15 = vld [vmem:[#allocation11] ss:$0 sm:$0xff]  ;;  %v3315_v35 = vld [vmem:[#allocation14] ss:$0 sm:$0xff]  ;;  %s4393_s7 = smov 104  }
 0x104   :  { %3509 = vmatprep.subr.bf16.mxu1 %v4389_v0  ;;  %3501 = vmatprep.subr.bf16.mxu0 %v4389_v0  ;;  %v3307_v20 = vld [vmem:[#allocation8] ss:$0 sm:$0xff]  ;;  %s5101_s10 = sld [smem:[#allocation41_spill]]  ;;  %vm2034_vm4 = vcmask 130048   ;;  %vm3159_vm5 = vcmask 523264  }
 0x105   :  { %s5102_s11 = sld [smem:[#allocation50_spill]] }
 0x106   :  { %v4611_v5 = vld [vmem:[%s5099_s9] sm:$0xff]  ;;  %v4614_v6 = vld [vmem:[%s5099_s9 + $0x8] sm:$0xff]  ;;  %s5103_s15 = sld [smem:[#allocation51_spill]] }
 0x107   :  { %v356_v9 = vadd.f32 %v4616_v7, %v4611_v5  ;;  %3510 = vmatpush3.bf16.msra.mxu1 %v3866_v3  ;;  %v357_v10 = vadd.f32 %v4618_v8, %v4614_v6  ;;  %3502 = vmatpush3.bf16.msra.mxu0 %v3867_v4  ;;  %v379_v14 = vpack.c.bf16 %v4614_v6, %v4611_v5  ;;  %s5104_s29 = sld [smem:[#allocation45_spill]] }
 0x108   :  { %3523 = vmatprep.subr.bf16.mxu1 %v4389_v0  ;;  %3515 = vmatprep.subr.bf16.mxu0 %v4389_v0  ;;  %s5105_s18 = sld [smem:[#allocation48_spill]] }
 0x109   :  { %v378_v12 = vpack.c.bf16 %v357_v10, %v356_v9  ;;  %s5106_s30 = sld [smem:[#allocation52_spill]] }
 0x10a   :  { %s5107_s8 = sld [smem:[#allocation47_spill]] }
 0x10b   :  { %3512 = vmatmul.mubr.msk.bf16.vlgmr.msra.gmra.mxu1 %vm398_vm1, %v378_v12  ;;  %3504 = vmatmul.mubr.msk.bf16.vlgmr.msra.gmra.mxu0 %vm398_vm1, %v378_v12  ;;  %s5108_s12 = sld [smem:[#allocation49_spill]] }
 0x10c   :  { %3516 = vmatpush3.bf16.msra.mxu0 %v3868_v11  ;;  %3519 = vmatprep.mubr.msk.bf16.mxu0 %vm4390_vm0, %v4389_v0 }
 0x10d   :  { %3517 = vmatprep.subr.bf16.mxu0 %v4389_v0  ;;  %3525 = vmatprep.mubr.msk.bf16.mxu1 %vm4390_vm0, %v4389_v0 }
 0x110   :  { %3518 = vmatpush3.bf16.msra.mxu0 %v3869_v13 }
 0x111   :  { %3529 = vmatprep.subr.bf16.mxu0 %v4389_v0 }
 0x113   :  { %3520 = vmatmul.mubr.msk.bf16.vlgmr.msra.gmra.mxu0 %vm398_vm1, %v379_v14 }
 0x114   :  { %3531 = vmatprep.mubr.msk.bf16.mxu0 %vm4390_vm0, %v4389_v0 }
 0x1cb   :  { %v495_v16 = vpop.f32.mrf.mxu1  ;;  %v436_v17 = vpop.f32.mrf.mxu0 }
 0x1cc   :  { %v496_v18 = vadd.f32 %v3311_v15, %v495_v16  ;;  %v437_v25 = vadd.f32 %v3307_v20, %v436_v17 }
 0x1cd   :  { %v3513_v19 = vpop.f32.mrf.mxu1  ;;  %v3505_v21 = vpop.f32.mrf.mxu0 }
 0x1ce   :  { %v4639_v22 = vpack.c.bf16 %v496_v18, %v496_v18  ;;  %v4646_v31 = vpack.c.bf16 %v437_v25, %v437_v25 }
 0x1cf   :  { %v498_v23 = vpop.f32.mrf.mxu1  ;;  %v439_v24 = vpop.f32.mrf.mxu0 }
 0x1d0   :  { %v499_v26 = vadd.f32 %v3311_v15, %v498_v23  ;;  %v575_v27 = vsel %vm570_vm2, %v4639_v22, 0  ;;  %v440_v33 = vadd.f32 %v3307_v20, %v439_v24 }
 0x1d1   :  { %v3514_v28 = vpop.f32.mrf.mxu1  ;;  %3524 = vmatpush3.bf16.xpose.msra.mxu1 %v575_v27  ;;  %v3506_v29 = vpop.f32.mrf.mxu0 }
 0x1d2   :  { %v4643_v30 = vpack.c.bf16 %v499_v26, %v499_v26  ;;  %3535 = vmatprep.subr.bf16.mxu1 %v4389_v0  ;;  %v4657_v34 = vpack.c.bf16 %v440_v33, %v440_v33 }
 0x1d3   :  { %v557_v36 = vpop.f32.mrf.mxu0 }
 0x1d4   :  { %837 = vrot.lane.b32.xlu1 %v4643_v30, %s4391_s3  ;;  %v621_v32 = vsel %vm570_vm2, %v4643_v30, 0  ;;  %v558_v38 = vadd.f32 %v3315_v35, %v557_v36 }
 0x1d5   :  { %3530 = vmatpush3.bf16.xpose.msra.mxu0 %v621_v32  ;;  %v3521_v37 = vpop.f32.mrf.mxu0 }
 0x1d6   :  { %3541 = vmatprep.subr.bf16.mxu0 %v4389_v0  ;;  %v4663_v42 = vpack.c.bf16 %v558_v38, %v558_v38 }
 0x1d7   :  { %v560_v39 = vpop.f32.mrf.mxu0 }
 0x1d8   :  { %3526 = vmatmul.mubr.msk.bf16.vlgmr.msra.gmra.mxu1 %vm570_vm2, %v4646_v31  ;;  %v561_v40 = vadd.f32 %v3315_v35, %v560_v39  ;;  %v692_v44 = vsel %vm690_vm3, %v4663_v42, 0 }
 0x1d9   :  { %3537 = vmatprep.mubr.msk.bf16.mxu1 %vm4390_vm0, %v4389_v0  ;;  %v3522_v41 = vpop.f32.mrf.mxu0  ;;  %3536 = vmatpush3.bf16.msra.mxu1 %v692_v44 }
 0x1da   :  { %v4665_v43 = vpack.c.bf16 %v561_v40, %v561_v40  ;;  %3547 = vmatprep.subr.bf16.mxu1 %v4389_v0 }
 0x1dc   :  { %3532 = vmatmul.mubr.msk.bf16.vlgmr.msra.gmra.mxu0 %vm570_vm2, %v4657_v34  ;;  %v738_v45 = vsel %vm690_vm3, %v4665_v43, 0 }
 0x1dd   :  { %3543 = vmatprep.mubr.msk.bf16.mxu0 %vm4390_vm0, %v4389_v0  ;;  %3542 = vmatpush3.bf16.msra.mxu0 %v738_v45 }
 0x1de   :  { %3553 = vmatprep.subr.bf16.mxu0 %v4389_v0 }
 0x246   :  { %v838_v3 = vpop.permute.xlu1 %837 }
 0x247   :  { %v843_v18 = vsel %vm570_vm2, %v838_v3, 0  ;;  %v373_v3 = vld [vmem:[%s5100_s21] sm:$0xf] }
 0x298   :  { %v611_v46 = vpop.f32.mrf.mxu1 }
 0x299   :  { %v663_v47 = vsel %vm570_vm2, %v611_v46, -inf }
 0x29a   :  { %664 = vmax.xlane.f32.xlu0 %v663_v47  ;;  %v3527_v48 = vpop.f32.mrf.mxu1 }
 0x29c   :  { %v614_v49 = vpop.f32.mrf.mxu1  ;;  %v657_v50 = vpop.f32.mrf.mxu0 }
 0x29d   :  { %v666_v51 = vsel %vm570_vm2, %v657_v50, -inf }
 0x29e   :  { %v3528_v52 = vpop.f32.mrf.mxu1  ;;  %667 = vmax.xlane.f32.xlu0 %v666_v51  ;;  %v3533_v53 = vpop.f32.mrf.mxu0 }
 0x2a0   :  { %v660_v54 = vpop.f32.mrf.mxu0 }
 0x2a2   :  { %v3534_v55 = vpop.f32.mrf.mxu0 }
 0x2b4   :  { %785 = vrot.lane.b32.xlu0 %v4639_v22, %s4391_s3 }
 0x323   :  { %v665_v56 = vpop.xlane.xlu0 %664 }
 0x324   :  { %v669_v57 = vsub.f32 %v611_v46, %v665_v56 }
 0x326   :  { %v671_v58 = vmul.f32 1.442695, %v669_v57 }
 0x327   :  { %v668_v59 = vpop.xlane.xlu0 %667 }
 0x328   :  { %3882 = vpow2.f32 %v671_v58  ;;  %v670_v60 = vsub.f32 %v657_v50, %v668_v59 }
 0x32a   :  { %v673_v61 = vmul.f32 1.442695, %v670_v60 }
 0x32b   :  { %v786_v12 = vpop.permute.xlu0 %785 }
 0x32c   :  { %3884 = vpow2.f32 %v673_v61  ;;  %v791_v15 = vsel %vm570_vm2, %v786_v12, 0 }
 0x335   :  { %v3883_v62 = vpop.eup %3882 }
 0x336   :  { %v675_v63 = vsel %vm570_vm2, %v3883_v62, 0.0 }
 0x337   :  { %676 = vadd.xlane.f32.xlu1 %v675_v63 }
 0x339   :  { %v3885_v1 = vpop.eup %3884 }
 0x33a   :  { %v678_v2 = vsel %vm570_vm2, %v3885_v1, 0.0 }
 0x33b   :  { %679 = vadd.xlane.f32.xlu1 %v678_v2 }
 0x34c   :  { %782 = vrot.lane.b32.xlu1 %v4646_v31, %s4391_s3 }
 0x350   :  { %834 = vrot.lane.b32.xlu1 %v4657_v34, %s4391_s3 }
 0x3c0   :  { %v677_v4 = vpop.xlane.xlu1 %676 }
 0x3c1   :  { %3886 = vrcp.f32 %v677_v4 }
 0x3c4   :  { %v680_v9 = vpop.xlane.xlu1 %679 }
 0x3c5   :  { %3888 = vrcp.f32 %v680_v9 }
 0x3c8   :  { %v783_v19 = vpop.permute.xlu1 %782 }
 0x3cc   :  { %v835_v20 = vpop.permute.xlu1 %834 }
 0x3ce   :  { %v3887_v10 = vpop.eup %3886 }
 0x3cf   :  { %v683_v11 = vmul.f32 %v3887_v10, %v3883_v62  ;;  %v1059_v10 = vsel %vm690_vm3, %v373_v3, 0 }
 0x3d1   :  { %v685_v13 = vpack.c.bf16 %v683_v11, %v683_v11 }
 0x3d2   :  { %v3889_v14 = vpop.eup %3888 }
 0x3d3   :  { %3538 = vmatmul.mubr.msk.bf16.vlgmr.msra.gmra.mxu1 %vm570_vm2, %v685_v13  ;;  %v684_v16 = vmul.f32 %v3889_v14, %v3885_v1 }
 0x3d4   :  { %3548 = vmatpush3.bf16.xpose.msra.mxu1 %v791_v15  ;;  %3549 = vmatprep.mubr.msk.bf16.mxu1 %vm4390_vm0, %v4389_v0  ;;  %v374_v15 = vld [vmem:[%s5100_s21 + $0x4] sm:$0xf] }
 0x3d5   :  { %v686_v17 = vpack.c.bf16 %v684_v16, %v684_v16  ;;  %3559 = vmatprep.subr.bf16.mxu1 %v4389_v0  ;;  %v1012_v16 = vsel %vm690_vm3, %v374_v15, 0 }
 0x3d7   :  { %3544 = vmatmul.mubr.msk.bf16.vlgmr.msra.gmra.mxu0 %vm570_vm2, %v686_v17 }
 0x3d8   :  { %3554 = vmatpush3.bf16.xpose.msra.mxu0 %v843_v18  ;;  %3555 = vmatprep.mubr.msk.bf16.mxu0 %vm4390_vm0, %v4389_v0 }
 0x3d9   :  { %3565 = vmatprep.subr.bf16.mxu0 %v4389_v0 }
 0x3db   :  { %3550 = vmatmul.mubr.msk.bf16.vlgmr.msra.gmra.mxu1 %vm570_vm2, %v783_v19 }
 0x3dc   :  { %3561 = vmatprep.mubr.msk.bf16.mxu1 %vm4390_vm0, %v4389_v0 }
 0x3df   :  { %3556 = vmatmul.mubr.msk.bf16.vlgmr.msra.gmra.mxu0 %vm570_vm2, %v835_v20 }
 0x3e0   :  { %3567 = vmatprep.mubr.msk.bf16.mxu0 %vm4390_vm0, %v4389_v0 }
 0x493   :  { %v4699_v21 = vpop.f32.mrf.mxu1 }
 0x495   :  { %v3539_v23 = vpop.f32.mrf.mxu1 }
 0x497   :  { %v731_v24 = vpop.f32.mrf.mxu1  ;;  %v4701_v25 = vpop.f32.mrf.mxu0 }
 0x498   :  { %v780_v26 = vpack.c.bf16 %v4701_v25, %v4699_v21 }
 0x499   :  { %v3540_v27 = vpop.f32.mrf.mxu1  ;;  %v3545_v28 = vpop.f32.mrf.mxu0 }
 0x49b   :  { %v777_v29 = vpop.f32.mrf.mxu0  ;;  %v827_v32 = vpop.f32.mrf.mxu1 }
 0x49c   :  { %v885_v33 = vsel %vm570_vm2, %v827_v32, -inf }
 0x49d   :  { %886 = vmax.xlane.f32.xlu0 %v885_v33  ;;  %v3546_v35 = vpop.f32.mrf.mxu0  ;;  %v3551_v36 = vpop.f32.mrf.mxu1 }
 0x49f   :  { %v830_v37 = vpop.f32.mrf.mxu1  ;;  %v879_v38 = vpop.f32.mrf.mxu0 }
 0x4a0   :  { %v888_v39 = vsel %vm570_vm2, %v879_v38, -inf }
 0x4a1   :  { %v3552_v40 = vpop.f32.mrf.mxu1  ;;  %889 = vmax.xlane.f32.xlu1 %v888_v39  ;;  %v3557_v41 = vpop.f32.mrf.mxu0 }
 0x4a3   :  { %v882_v44 = vpop.f32.mrf.mxu0 }
 0x4a5   :  { %v3558_v45 = vpop.f32.mrf.mxu0 }
 0x4b2   :  { %959 = vrot.lane.b32.xlu1 %v4665_v43, %s4391_s3 }
 0x4b6   :  { %1104 = vrot.lane.b32.xlu1 %v4639_v22, %s4392_s2 }
 0x4ba   :  { %1154 = vrot.lane.b32.xlu1 %v4643_v30, %s4392_s2 }
 0x4be   :  { %1152 = vrot.lane.b32.xlu1 %v4657_v34, %s4392_s2 }
 0x526   :  { %v887_v46 = vpop.xlane.xlu0 %886 }
 0x527   :  { %v891_v47 = vsub.f32 %v827_v32, %v887_v46 }
 0x529   :  { %v893_v48 = vmul.f32 1.442695, %v891_v47 }
 0x52a   :  { %v890_v49 = vpop.xlane.xlu1 %889 }
 0x52b   :  { %3890 = vpow2.f32 %v893_v48  ;;  %v892_v50 = vsub.f32 %v879_v38, %v890_v49 }
 0x52d   :  { %v895_v51 = vmul.f32 1.442695, %v892_v50 }
 0x52e   :  { %v960_v52 = vpop.permute.xlu1 %959 }
 0x52f   :  { %3892 = vpow2.f32 %v895_v51  ;;  %v965_v53 = vsel %vm690_vm3, %v960_v52, 0 }
 0x530   :  { %3566 = vmatpush3.bf16.msra.mxu0 %v965_v53 }
 0x531   :  { %3577 = vmatprep.subr.bf16.mxu0 %v4389_v0 }
 0x532   :  { %v1105_v11 = vpop.permute.xlu1 %1104 }
 0x533   :  { %v1110_v25 = vsel %vm570_vm2, %v1105_v11, 0 }
 0x536   :  { %v1155_v12 = vpop.permute.xlu1 %1154 }
 0x537   :  { %v1160_v13 = vsel %vm570_vm2, %v1155_v12, 0 }
 0x538   :  { %v3891_v54 = vpop.eup %3890 }
 0x539   :  { %v897_v55 = vsel %vm570_vm2, %v3891_v54, 0.0 }
 0x53a   :  { %898 = vadd.xlane.f32.xlu0 %v897_v55  ;;  %v1153_v14 = vpop.permute.xlu1 %1152 }
 0x53c   :  { %v3893_v56 = vpop.eup %3892 }
 0x53d   :  { %v900_v57 = vsel %vm570_vm2, %v3893_v56, 0.0 }
 0x53e   :  { %901 = vadd.xlane.f32.xlu0 %v900_v57 }
 0x554   :  { %910 = vrot.lane.b32.xlu0 %v4663_v42, %s4391_s3 }
 0x558   :  { %1102 = vrot.lane.b32.xlu0 %v4646_v31, %s4392_s2 }
 0x5c3   :  { %v899_v58 = vpop.xlane.xlu0 %898 }
 0x5c4   :  { %3894 = vrcp.f32 %v899_v58 }
 0x5c7   :  { %v902_v59 = vpop.xlane.xlu0 %901 }
 0x5c8   :  { %3896 = vrcp.f32 %v902_v59 }
 0x5cb   :  { %v911_v60 = vpop.permute.xlu0 %910 }
 0x5cc   :  { %v916_v61 = vsel %vm690_vm3, %v911_v60, 0 }
 0x5cd   :  { %3560 = vmatpush3.bf16.msra.mxu1 %v916_v61 }
 0x5ce   :  { %3571 = vmatprep.subr.bf16.mxu1 %v4389_v0 }
 0x5cf   :  { %v1103_v29 = vpop.permute.xlu0 %1102 }
 0x5d1   :  { %v3895_v62 = vpop.eup %3894 }
 0x5d2   :  { %v905_v63 = vmul.f32 %v3895_v62, %v3891_v54 }
 0x5d4   :  { %v907_v1 = vpack.c.bf16 %v905_v63, %v905_v63 }
 0x5d5   :  { %v3897_v2 = vpop.eup %3896 }
 0x5d6   :  { %3562 = vmatmul.mubr.msk.bf16.vlgmr.msra.gmra.mxu1 %vm570_vm2, %v907_v1  ;;  %v906_v4 = vmul.f32 %v3897_v2, %v3893_v56 }
 0x5d7   :  { %3573 = vmatprep.mubr.msk.bf16.mxu1 %vm4390_vm0, %v4389_v0  ;;  %3572 = vmatpush3.bf16.msra.mxu1 %v1012_v16 }
 0x5d8   :  { %v908_v9 = vpack.c.bf16 %v906_v4, %v906_v4  ;;  %3583 = vmatprep.subr.bf16.mxu1 %v4389_v0 }
 0x5da   :  { %3568 = vmatmul.mubr.msk.bf16.vlgmr.msra.gmra.mxu0 %vm570_vm2, %v908_v9 }
 0x5db   :  { %3578 = vmatpush3.bf16.msra.mxu0 %v1059_v10  ;;  %3579 = vmatprep.mubr.msk.bf16.mxu0 %vm4390_vm0, %v4389_v0 }
 0x5dc   :  { %3589 = vmatprep.subr.bf16.mxu0 %v4389_v0 }
 0x5e2   :  { %3580 = vmatmul.mubr.msk.bf16.vlgmr.msra.gmra.mxu0 %vm570_vm2, %v780_v26 }
 0x5e3   :  { %3590 = vmatpush3.bf16.xpose.msra.mxu0 %v1160_v13  ;;  %3591 = vmatprep.mubr.msk.bf16.mxu0 %vm4390_vm0, %v4389_v0 }
 0x5e4   :  { %3601 = vmatprep.subr.bf16.mxu0 %v4389_v0 }
 0x5ea   :  { %3592 = vmatmul.mubr.msk.bf16.vlgmr.msra.gmra.mxu0 %vm570_vm2, %v1153_v14 }
 0x5eb   :  { %3603 = vmatprep.mubr.msk.bf16.mxu0 %vm4390_vm0, %v4389_v0 }
 0x696   :  { %v952_v17 = vpop.f32.mrf.mxu1 }
 0x698   :  { %v3563_v18 = vpop.f32.mrf.mxu1 }
 0x699   :  { %v375_v18 = vld [vmem:[%s5100_s21 + $0x8] sm:$0xf] }
 0x69a   :  { %v955_v19 = vpop.f32.mrf.mxu1  ;;  %v1001_v20 = vpop.f32.mrf.mxu0 }
 0x69b   :  { %v1007_v21 = vpack.c.bf16 %v1001_v20, %v952_v17  ;;  %v1327_v19 = vsel %vm690_vm3, %v375_v18, 0 }
 0x69c   :  { %v3564_v23 = vpop.f32.mrf.mxu1  ;;  %v3569_v24 = vpop.f32.mrf.mxu0 }
 0x69d   :  { %3574 = vmatmul.mubr.msk.bf16.vlgmr.msra.gmra.mxu1 %vm570_vm2, %v1007_v21 }
 0x69e   :  { %3584 = vmatpush3.bf16.xpose.msra.mxu1 %v1110_v25  ;;  %v1004_v26 = vpop.f32.mrf.mxu0  ;;  %3585 = vmatprep.mubr.msk.bf16.mxu1 %vm4390_vm0, %v4389_v0 }
 0x69f   :  { %3595 = vmatprep.subr.bf16.mxu1 %v4389_v0 }
 0x6a0   :  { %v3570_v27 = vpop.f32.mrf.mxu0 }
 0x6a2   :  { %v4753_v28 = vpop.f32.mrf.mxu0 }
 0x6a4   :  { %v3581_v32 = vpop.f32.mrf.mxu0 }
 0x6a5   :  { %3586 = vmatmul.mubr.msk.bf16.vlgmr.msra.gmra.mxu1 %vm570_vm2, %v1103_v29 }
 0x6a6   :  { %v4756_v33 = vpop.f32.mrf.mxu0  ;;  %3597 = vmatprep.mubr.msk.bf16.mxu1 %vm4390_vm0, %v4389_v0 }
 0x6a8   :  { %v3582_v35 = vpop.f32.mrf.mxu0 }
 0x6aa   :  { %v1196_v36 = vpop.f32.mrf.mxu0 }
 0x6ab   :  { %v1205_v37 = vsel %vm570_vm2, %v1196_v36, -inf }
 0x6ac   :  { %1206 = vmax.xlane.f32.xlu1 %v1205_v37  ;;  %v3593_v38 = vpop.f32.mrf.mxu0 }
 0x6ae   :  { %v1199_v39 = vpop.f32.mrf.mxu0 }
 0x6b0   :  { %v3594_v40 = vpop.f32.mrf.mxu0 }
 0x6bd   :  { %1274 = vrot.lane.b32.xlu1 %v4665_v43, %s4392_s2 }
 0x6c1   :  { %1374 = vrot.lane.b32.xlu1 %v4639_v22, %s4393_s7 }
 0x6c5   :  { %1424 = vrot.lane.b32.xlu1 %v4643_v30, %s4393_s7 }
 0x6c9   :  { %1422 = vrot.lane.b32.xlu1 %v4657_v34, %s4393_s7 }
 0x735   :  { %v1207_v41 = vpop.xlane.xlu1 %1206 }
 0x736   :  { %v1209_v46 = vsub.f32 %v1196_v36, %v1207_v41 }
 0x738   :  { %v1212_v47 = vmul.f32 1.442695, %v1209_v46 }
 0x739   :  { %v1275_v44 = vpop.permute.xlu1 %1274 }
 0x73a   :  { %v1280_v45 = vsel %vm690_vm3, %v1275_v44, 0  ;;  %3898 = vpow2.f32 %v1212_v47 }
 0x73b   :  { %3602 = vmatpush3.bf16.msra.mxu0 %v1280_v45 }
 0x73c   :  { %3613 = vmatprep.subr.bf16.mxu0 %v4389_v0 }
 0x73d   :  { %v1375_v1 = vpop.permute.xlu1 %1374 }
 0x73e   :  { %v1380_v3 = vsel %vm570_vm2, %v1375_v1, 0 }
 0x741   :  { %v1425_v26 = vpop.permute.xlu1 %1424 }
 0x742   :  { %v1430_v35 = vsel %vm570_vm2, %v1425_v26, 0 }
 0x745   :  { %v1423_v38 = vpop.permute.xlu1 %1422 }
 0x747   :  { %v3899_v34 = vpop.eup %3898 }
 0x748   :  { %v1217_v54 = vsel %vm570_vm2, %v3899_v34, 0.0 }
 0x75d   :  { %v4771_v48 = vpop.f32.mrf.mxu1 }
 0x75e   :  { %v1096_v46 = vadd.f32 %v4753_v28, %v4771_v48 }
 0x75f   :  { %v3575_v49 = vpop.f32.mrf.mxu1 }
 0x761   :  { %v4773_v22 = vpop.f32.mrf.mxu1 }
 0x763   :  { %v3576_v50 = vpop.f32.mrf.mxu1 }
 0x765   :  { %v1146_v30 = vpop.f32.mrf.mxu1 }
 0x766   :  { %v1202_v51 = vsel %vm570_vm2, %v1146_v30, -inf }
 0x767   :  { %1203 = vmax.xlane.f32.xlu0 %v1202_v51  ;;  %v3587_v52 = vpop.f32.mrf.mxu1 }
 0x769   :  { %v1149_v53 = vpop.f32.mrf.mxu1 }
 0x76b   :  { %v3588_v55 = vpop.f32.mrf.mxu1  ;;  %1218 = vadd.xlane.f32.xlu0 %v1217_v54 }
 0x7f0   :  { %v1204_v56 = vpop.xlane.xlu0 %1203 }
 0x7f1   :  { %v1208_v57 = vsub.f32 %v1146_v30, %v1204_v56  ;;  %v1099_v30 = vadd.f32 %v4756_v33, %v4773_v22 }
 0x7f3   :  { %v1210_v58 = vmul.f32 1.442695, %v1208_v57 }
 0x7f4   :  { %v1219_v59 = vpop.xlane.xlu0 %1218 }
 0x7f5   :  { %3900 = vpow2.f32 %v1210_v58 }
 0x7f6   :  { %3902 = vrcp.f32 %v1219_v59 }
 0x802   :  { %v3901_v60 = vpop.eup %3900 }
 0x803   :  { %v3903_v61 = vpop.eup %3902  ;;  %v1214_v62 = vsel %vm570_vm2, %v3901_v60, 0.0 }
 0x804   :  { %1215 = vadd.xlane.f32.xlu0 %v1214_v62  ;;  %v1223_v63 = vmul.f32 %v3903_v61, %v3899_v34 }
 0x806   :  { %v1225_v2 = vpack.c.bf16 %v1223_v63, %v1223_v63 }
 0x808   :  { %3604 = vmatmul.mubr.msk.bf16.vlgmr.msra.gmra.mxu0 %vm570_vm2, %v1225_v2 }
 0x809   :  { %3614 = vmatpush3.bf16.xpose.msra.mxu0 %v1380_v3  ;;  %3615 = vmatprep.mubr.msk.bf16.mxu0 %vm4390_vm0, %v4389_v0 }
 0x80a   :  { %3625 = vmatprep.subr.bf16.mxu0 %v4389_v0 }
 0x81a   :  { %1226 = vrot.lane.b32.xlu0 %v4663_v42, %s4392_s2 }
 0x81e   :  { %1372 = vrot.lane.b32.xlu0 %v4646_v31, %s4393_s7 }
 0x88d   :  { %v1216_v4 = vpop.xlane.xlu0 %1215 }
 0x88e   :  { %3904 = vrcp.f32 %v1216_v4 }
 0x891   :  { %v1227_v9 = vpop.permute.xlu0 %1226 }
 0x892   :  { %v1232_v10 = vsel %vm690_vm3, %v1227_v9, 0 }
 0x893   :  { %3596 = vmatpush3.bf16.msra.mxu1 %v1232_v10  ;;  %v376_v10 = vld [vmem:[%s5100_s21 + $0xc] sm:$0xf] }
 0x894   :  { %3607 = vmatprep.subr.bf16.mxu1 %v4389_v0 }
 0x895   :  { %v1373_v11 = vpop.permute.xlu0 %1372 }
 0x896   :  { %3616 = vmatmul.mubr.msk.bf16.vlgmr.msra.gmra.mxu0 %vm570_vm2, %v1373_v11  ;;  %v1597_v11 = vsel %vm690_vm3, %v376_v10, 0 }
 0x897   :  { %3627 = vmatprep.mubr.msk.bf16.mxu0 %vm4390_vm0, %v4389_v0 }
 0x89b   :  { %v3905_v12 = vpop.eup %3904 }
 0x89c   :  { %v1222_v13 = vmul.f32 %v3905_v12, %v3901_v60 }
 0x89e   :  { %v1224_v14 = vpack.c.bf16 %v1222_v13, %v1222_v13 }
 0x8a0   :  { %3598 = vmatmul.mubr.msk.bf16.vlgmr.msra.gmra.mxu1 %vm570_vm2, %v1224_v14 }
 0x8a1   :  { %3609 = vmatprep.mubr.msk.bf16.mxu1 %vm4390_vm0, %v4389_v0  ;;  %3608 = vmatpush3.bf16.msra.mxu1 %v1327_v19 }
 0x8a2   :  { %3619 = vmatprep.subr.bf16.mxu1 %v4389_v0 }
 0x8c8   :  { %v1316_v31 = vpop.f32.mrf.mxu0 }
 0x8ca   :  { %v3605_v15 = vpop.f32.mrf.mxu0 }
 0x8cc   :  { %v1319_v16 = vpop.f32.mrf.mxu0 }
 0x8ce   :  { %v3606_v17 = vpop.f32.mrf.mxu0 }
 0x956   :  { %v1416_v20 = vpop.f32.mrf.mxu0 }
 0x957   :  { %v1472_v21 = vsel %vm570_vm2, %v1416_v20, -inf }
 0x958   :  { %1473 = vmax.xlane.f32.xlu0 %v1472_v21  ;;  %v3617_v23 = vpop.f32.mrf.mxu0 }
 0x95a   :  { %v1419_v24 = vpop.f32.mrf.mxu0 }
 0x95c   :  { %v3618_v25 = vpop.f32.mrf.mxu0 }
 0x960   :  { %v1268_v27 = vpop.f32.mrf.mxu1 }
 0x961   :  { %v1322_v29 = vpack.c.bf16 %v1316_v31, %v1268_v27 }
 0x962   :  { %v3599_v32 = vpop.f32.mrf.mxu1 }
 0x963   :  { %3610 = vmatmul.mubr.msk.bf16.vlgmr.msra.gmra.mxu1 %vm570_vm2, %v1322_v29 }
 0x964   :  { %3620 = vmatpush3.bf16.xpose.msra.mxu1 %v1430_v35  ;;  %v1271_v36 = vpop.f32.mrf.mxu1  ;;  %3621 = vmatprep.mubr.msk.bf16.mxu1 %vm4390_vm0, %v4389_v0 }
 0x965   :  { %3631 = vmatprep.subr.bf16.mxu1 %v4389_v0 }
 0x966   :  { %v3600_v37 = vpop.f32.mrf.mxu1 }
 0x96b   :  { %3622 = vmatmul.mubr.msk.bf16.vlgmr.msra.gmra.mxu1 %vm570_vm2, %v1423_v38 }
 0x96c   :  { %3633 = vmatprep.mubr.msk.bf16.mxu1 %vm4390_vm0, %v4389_v0 }
 0x9e1   :  { %v1474_v39 = vpop.xlane.xlu0 %1473 }
 0x9e2   :  { %v1478_v40 = vsub.f32 %v1416_v20, %v1474_v39  ;;  %v3339_v20 = vld [vmem:[#allocation16] ss:$0 sm:$0xff] }
 0x9e4   :  { %v1480_v41 = vmul.f32 1.442695, %v1478_v40 }
 0x9e6   :  { %3906 = vpow2.f32 %v1480_v41 }
 0x9f3   :  { %v3907_v44 = vpop.eup %3906 }
 0x9f4   :  { %v1484_v45 = vsel %vm570_vm2, %v3907_v44, 0.0 }
 0x9f5   :  { %1485 = vadd.xlane.f32.xlu0 %v1484_v45 }
 0xa23   :  { %v1363_v47 = vpop.f32.mrf.mxu1 }
 0xa24   :  { %v1370_v49 = vadd.f32 %v1363_v47, %v1096_v46 }
 0xa25   :  { %v3611_v50 = vpop.f32.mrf.mxu1 }
 0xa26   :  { %v3870_v50 = vld [vmem:[#allocation20 + $0x8] sm:$0xff]  }
 0xa27   :  { %v1366_v51 = vpop.f32.mrf.mxu1 }
 0xa28   :  { %v1371_v34 = vadd.f32 %v1366_v51, %v1099_v30  ;;  %v3871_v30 = vld [vmem:[#allocation20] sm:$0xff]  }
 0xa29   :  { %v3612_v52 = vpop.f32.mrf.mxu1  ;;  %v348_v51 = vld [vmem:[%s5101_s10] sm:$0xff] }
 0xa2a   :  { %v352_v52 = vld [vmem:[#allocation5] sm:$0xff] }
 0xa2b   :  { %v1466_v53 = vpop.f32.mrf.mxu1 }
 0xa2c   :  { %v1475_v54 = vsel %vm570_vm2, %v1466_v53, -inf }
 0xa2d   :  { %1476 = vmax.xlane.f32.xlu1 %v1475_v54  ;;  %v3623_v55 = vpop.f32.mrf.mxu1  ;;  %v350_v54 = vld [vmem:[%s5101_s10 + $0x10] sm:$0xff] }
 0xa2e   :  { %v1699_v55 = vadd.f32 %v352_v52, %v348_v51 }
 0xa2f   :  { %v1469_v56 = vpop.f32.mrf.mxu1 }
 0xa31   :  { %v3624_v57 = vpop.f32.mrf.mxu1 }
 0xa32   :  { %v351_v57 = vld [vmem:[%s5101_s10 + $0x18] sm:$0xff] }
 0xa3e   :  { %1544 = vrot.lane.b32.xlu1 %v4665_v43, %s4393_s7 }
 0xa7e   :  { %v1486_v61 = vpop.xlane.xlu0 %1485 }
 0xab6   :  { %v1477_v28 = vpop.xlane.xlu1 %1476 }
 0xab7   :  { %v1479_v48 = vsub.f32 %v1466_v53, %v1477_v28  ;;  %v353_v53 = vld [vmem:[#allocation5 + $0x8] sm:$0xff]  ;;  %v354_v28 = vld [vmem:[#allocation5 + $0x10] sm:$0xff] }
 0xab9   :  { %v1482_v58 = vmul.f32 1.442695, %v1479_v48  ;;  %v355_v48 = vld [vmem:[#allocation5 + $0x18] sm:$0xff] }
 0xaba   :  { %v1545_v59 = vpop.permute.xlu1 %1544 }
 0xabb   :  { %3908 = vpow2.f32 %v1482_v58  ;;  %v1550_v33 = vsel %vm690_vm3, %v1545_v59, 0  ;;  %v1701_v58 = vadd.f32 %v354_v28, %v350_v54  ;;  %v1702_v59 = vadd.f32 %v355_v48, %v351_v57 }
 0xabc   :  { %3632 = vmatpush3.bf16.msra.mxu1 %v1550_v33  ;;  %3910 = vrcp.f32 %v1486_v61  ;;  %v3873_v61 = vld [vmem:[#allocation17] sm:$0xff]  }
 0xabd   :  { %3643 = vmatprep.subr.bf16.mxu1 %v4389_v0 }
 0xac8   :  { %v3909_v22 = vpop.eup %3908 }
 0xac9   :  { %v1487_v60 = vsel %vm570_vm2, %v3909_v22, 0.0  ;;  %v3911_v43 = vpop.eup %3910 }
 0xaca   :  { %1488 = vadd.xlane.f32.xlu0 %v1487_v60  ;;  %v1492_v63 = vmul.f32 %v3911_v43, %v3907_v44  ;;  %v3872_v60 = vld [vmem:[#allocation17 + $0x8] sm:$0xff]  }
 0xacb   :  { %v3874_v43 = vld [vmem:[#allocation23 + $0x8] sm:$0xff]  }
 0xacc   :  { %v1494_v3 = vpack.c.bf16 %v1492_v63, %v1492_v63 }
 0xae0   :  { %1496 = vrot.lane.b32.xlu0 %v4663_v42, %s4393_s7 }
 0xb53   :  { %v1489_v62 = vpop.xlane.xlu0 %1488 }
 0xb54   :  { %3912 = vrcp.f32 %v1489_v62 }
 0xb57   :  { %v1497_v1 = vpop.permute.xlu0 %1496 }
 0xb58   :  { %v1502_v2 = vsel %vm690_vm3, %v1497_v1, 0 }
 0xb59   :  { %3626 = vmatpush3.bf16.msra.mxu0 %v1502_v2 }
 0xb5a   :  { %3637 = vmatprep.subr.bf16.mxu0 %v4389_v0 }
 0xb5c   :  { %3628 = vmatmul.mubr.msk.bf16.vlgmr.msra.gmra.mxu0 %vm570_vm2, %v1494_v3 }
 0xb5d   :  { %3639 = vmatprep.mubr.msk.bf16.mxu0 %vm4390_vm0, %v4389_v0  ;;  %3638 = vmatpush3.bf16.msra.mxu0 %v1597_v11 }
 0xb5e   :  { %3651 = vmatprep.subr.bf16.mxu0 %v3870_v50 }
 0xb61   :  { %v3913_v42 = vpop.eup %3912 }
 0xb62   :  { %v1493_v4 = vmul.f32 %v3913_v42, %v3909_v22  ;;  %v1725_v22 = vpack.c.bf16 %v1702_v59, %v1701_v58 }
 0xb64   :  { %v1495_v9 = vpack.c.bf16 %v1493_v4, %v1493_v4 }
 0xb66   :  { %3634 = vmatmul.mubr.msk.bf16.vlgmr.msra.gmra.mxu1 %vm570_vm2, %v1495_v9  ;;  %v3340_v9 = vld [vmem:[%s5102_s11] ss:$0 sm:$0xff] }
 0xb67   :  { %3647 = vmatprep.mubr.msk.bf16.mxu1 %vm4390_vm0, %v4389_v0  ;;  %3644 = vmatpush3.bf16.msra.mxu1 %v3872_v60 }
 0xb68   :  { %3645 = vmatprep.subr.bf16.mxu1 %v4389_v0 }
 0xb6b   :  { %3646 = vmatpush3.bf16.msra.mxu1 %v3873_v61 }
 0xb6c   :  { %3659 = vmatprep.subr.bf16.mxu1 %v3874_v43 }
 0xc1c   :  { %v1538_v12 = vpop.f32.mrf.mxu0 }
 0xc1e   :  { %v3629_v13 = vpop.f32.mrf.mxu0 }
 0xc1f   :  { %v3341_v13 = vld [vmem:[%s5103_s15] ss:$0 sm:$0xff] }
 0xc20   :  { %v1541_v14 = vpop.f32.mrf.mxu0 }
 0xc22   :  { %v3630_v31 = vpop.f32.mrf.mxu0 }
 0xc26   :  { %v1586_v15 = vpop.f32.mrf.mxu1 }
 0xc27   :  { %v1592_v16 = vpack.c.bf16 %v1586_v15, %v1538_v12 }
 0xc28   :  { %v3635_v17 = vpop.f32.mrf.mxu1 }
 0xc29   :  { %3640 = vmatmul.mubr.msk.bf16.vlgmr.msra.gmra.mxu0 %vm570_vm2, %v1592_v16 }
 0xc2a   :  { %v1589_v18 = vpop.f32.mrf.mxu1  ;;  %3652 = vmatpush3.bf16.msra.mxu0 %v3870_v50 }
 0xc2b   :  { %3653 = vmatprep.subr.bf16.mxu0 %v3871_v30 }
 0xc2c   :  { %v3636_v19 = vpop.f32.mrf.mxu1 }
 0xc2e   :  { %3654 = vmatpush3.bf16.msra.mxu0 %v3871_v30  ;;  %v3351_v30 = vld [vmem:[#allocation25] ss:$0 sm:$0xff] }
 0xc2f   :  { %3667 = vmatprep.subr.bf16.mxu0 %v4389_v0 }
 0xce9   :  { %v1633_v21 = vpop.f32.mrf.mxu0 }
 0xcea   :  { %v1640_v23 = vadd.f32 %v1633_v21, %v1370_v49  ;;  %v3875_v21 = vld [vmem:[#allocation23] sm:$0xff]  }
 0xceb   :  { %v3641_v24 = vpop.f32.mrf.mxu0 }
 0xcec   :  { %v1648_v25 = vadd.f32 %v3339_v20, %v1640_v23  ;;  %v1727_v23 = vpack.c.bf16 %v351_v57, %v350_v54 }
 0xced   :  { %v1636_v26 = vpop.f32.mrf.mxu0 }
 0xcee   :  { %v1641_v27 = vadd.f32 %v1636_v26, %v1371_v34  ;;  %v1650_v29 = vadd.f32 %v1648_v25, %v4611_v5  ;;  %v349_v34 = vld [vmem:[%s5101_s10 + $0x8] sm:$0xff] }
 0xcef   :  { %v3642_v32 = vpop.f32.mrf.mxu0  ;;  %v1700_v56 = vadd.f32 %v353_v53, %v349_v34  ;;  %v1726_v19 = vpack.c.bf16 %v349_v34, %v348_v51 }
 0xcf0   :  { %v1649_v35 = vadd.f32 %v3339_v20, %v1641_v27  ;;  %v1654_v36 = vsel %vm398_vm1, %v1650_v29, 0.0 }
 0xcf1   :  { %1655 = vadd.xlane.f32.xlu1 %v1654_v36  ;;  %v1724_v33 = vpack.c.bf16 %v1700_v56, %v1699_v55 }
 0xcf2   :  { %v1651_v37 = vadd.f32 %v1649_v35, %v4614_v6 }
 0xcf3   :  { %3655 = vmatprep.mubr.msk.bf16.mxu0 %vm398_vm1, %v1724_v33 }
 0xcf4   :  { %v1657_v38 = vsel %vm398_vm1, %v1651_v37, 0.0  ;;  %3656 = vmatmul.mubr.msk.bf16.vlgmr.msra.gmra.mxu0 %vm398_vm1, %v1725_v22 }
 0xcf5   :  { %1658 = vadd.xlane.f32.xlu0 %v1657_v38  ;;  %3669 = vmatprep.mubr.msk.bf16.mxu0 %vm4390_vm0, %v4389_v0 }
 0xd7a   :  { %v1656_v39 = vpop.xlane.xlu1 %1655 }
 0xd7b   :  { %v1661_v40 = vmul.f32 0.03125, %v1656_v39 }
 0xd7d   :  { %v1663_v41 = vsub.f32 %v1650_v29, %v1661_v40  ;;  %v3342_v40 = vld [vmem:[#allocation19] ss:$0 sm:$0xff] }
 0xd7e   :  { %v1659_v44 = vpop.xlane.xlu0 %1658 }
 0xd7f   :  { %v1662_v45 = vmul.f32 0.03125, %v1659_v44  ;;  %v1665_v46 = vmul.f32 %v1663_v41, %v1663_v41 }
 0xd81   :  { %v1664_v5 = vsub.f32 %v1651_v37, %v1662_v45  ;;  %v1667_v47 = vsel %vm398_vm1, %v1665_v46, 0.0 }
 0xd82   :  { %1668 = vadd.xlane.f32.xlu0 %v1667_v47 }
 0xd83   :  { %v1666_v49 = vmul.f32 %v1664_v5, %v1664_v5 }
 0xd85   :  { %v1670_v6 = vsel %vm398_vm1, %v1666_v49, 0.0 }
 0xd86   :  { %1671 = vadd.xlane.f32.xlu1 %v1670_v6 }
 0xe0b   :  { %v1669_v62 = vpop.xlane.xlu0 %1668 }
 0xe0c   :  { %v1673_v63 = vmul.f32 0.03125, %v1669_v62 }
 0xe0e   :  { %v1675_v1 = vadd.f32 1e-05, %v1673_v63 }
 0xe0f   :  { %v1672_v2 = vpop.xlane.xlu1 %1671 }
 0xe10   :  { %3914 = vrsqrt.f32 %v1675_v1  ;;  %v1674_v3 = vmul.f32 0.03125, %v1672_v2 }
 0xe12   :  { %v1676_v42 = vadd.f32 1e-05, %v1674_v3 }
 0xe14   :  { %3916 = vrsqrt.f32 %v1676_v42 }
 0xe1d   :  { %v3915_v4 = vpop.eup %3914 }
 0xe1e   :  { %v1679_v10 = vmul.f32 %v3915_v4, %v1663_v41 }
 0xe20   :  { %v1687_v11 = vmul.f32 %v3340_v9, %v1679_v10 }
 0xe21   :  { %v3917_v12 = vpop.eup %3916 }
 0xe22   :  { %v1680_v14 = vmul.f32 %v3917_v12, %v1664_v5  ;;  %v4849_v15 = vadd.f32 %v3341_v13, %v1687_v11 }
 0xe24   :  { %v1688_v31 = vmul.f32 %v3340_v9, %v1680_v14  ;;  %v1697_v17 = vadd.f32 %v4849_v15, %v4616_v7  ;;  %v3657_v7 = vpop.f32.mrf.mxu0 }
 0xe26   :  { %v4851_v16 = vadd.f32 %v3341_v13, %v1688_v31  ;;  %v1848_v24 = vpop.f32.mrf.mxu0 }
 0xe28   :  { %v1698_v18 = vadd.f32 %v4851_v16, %v4618_v8  ;;  %v3346_v8 = vld [vmem:[#allocation22] ss:$0 sm:$0xff]  ;;  %v3658_v26 = vpop.f32.mrf.mxu0 }
 0xe29   :  { %v1857_v25 = vadd.f32 %v3657_v7, %v3346_v8  ;;  %v1849_v27 = vadd.f32 %v3346_v8, %v1848_v24  ;;  %v1860_v29 = vadd.f32 %v3658_v26, %v3346_v8 }
 0xe2a   :  { %v1723_v20 = vpack.c.bf16 %v1698_v18, %v1697_v17  ;;  %v1851_v32 = vpop.f32.mrf.mxu0 }
 0xe2b   :  { %v4863_v35 = vpack.c.bf16 %v1860_v29, %v1857_v25  ;;  %v1852_v36 = vadd.f32 %v3346_v8, %v1851_v32 }
 0xe2c   :  { %3648 = vmatmul.mubr.msk.bf16.vlgmr.msra.gmra.mxu1 %vm398_vm1, %v1723_v20 }
 0xe2d   :  { %3660 = vmatpush3.bf16.msra.mxu1 %v3874_v43  ;;  %3663 = vmatprep.mubr.msk.bf16.mxu1 %vm398_vm1, %v1726_v19  ;;  %v4865_v37 = vpack.c.bf16 %v1852_v36, %v1849_v27  ;;  %v1992_v38 = vsel %vm570_vm2, %v4863_v35, 0 }
 0xe2e   :  { %3661 = vmatprep.subr.bf16.mxu1 %v3875_v21 }
 0xe2f   :  { %v1946_v39 = vsel %vm570_vm2, %v4865_v37, 0 }
 0xe30   :  { %3668 = vmatpush3.bf16.xpose.msra.mxu0 %v1946_v39 }
 0xe31   :  { %3662 = vmatpush3.bf16.msra.mxu1 %v3875_v21  ;;  %3679 = vmatprep.subr.bf16.mxu0 %v4389_v0 }
 0xe32   :  { %3673 = vmatprep.subr.bf16.mxu1 %v4389_v0 }
 0xe34   :  { %3664 = vmatmul.mubr.msk.bf16.vlgmr.msra.gmra.mxu1 %vm398_vm1, %v1727_v23 }
 0xe35   :  { %3675 = vmatprep.mubr.msk.bf16.mxu1 %vm4390_vm0, %v4389_v0  ;;  %3674 = vmatpush3.bf16.xpose.msra.mxu1 %v1992_v38 }
 0xe36   :  { %3685 = vmatprep.subr.bf16.mxu1 %v4389_v0 }
 0xeec   :  { %v1783_v41 = vpop.f32.mrf.mxu1 }
 0xeed   :  { %v1784_v44 = vadd.f32 %v3342_v40, %v1783_v41 }
 0xeee   :  { %v3649_v45 = vpop.f32.mrf.mxu1 }
 0xeef   :  { %v4873_v46 = vpack.c.bf16 %v1784_v44, %v1784_v44 }
 0xef0   :  { %v1786_v5 = vpop.f32.mrf.mxu1 }
 0xef1   :  { %v1787_v47 = vadd.f32 %v3342_v40, %v1786_v5  ;;  %3670 = vmatmul.mubr.msk.bf16.vlgmr.msra.gmra.mxu0 %vm570_vm2, %v4873_v46 }
 0xef2   :  { %v3650_v49 = vpop.f32.mrf.mxu1  ;;  %3681 = vmatprep.mubr.msk.bf16.mxu0 %vm4390_vm0, %v4389_v0 }
 0xef3   :  { %v4879_v6 = vpack.c.bf16 %v1787_v47, %v1787_v47 }
 0xef4   :  { %v3665_v50 = vpop.f32.mrf.mxu1 }
 0xef5   :  { %3676 = vmatmul.mubr.msk.bf16.vlgmr.msra.gmra.mxu1 %vm570_vm2, %v4879_v6  ;;  %v1930_v34 = vadd.f32 %v3665_v50, %v3351_v30 }
 0xef6   :  { %v1921_v51 = vpop.f32.mrf.mxu1  ;;  %3687 = vmatprep.mubr.msk.bf16.mxu1 %vm4390_vm0, %v4389_v0 }
 0xef7   :  { %v1922_v53 = vadd.f32 %v3351_v30, %v1921_v51 }
 0xef8   :  { %v3666_v52 = vpop.f32.mrf.mxu1 }
 0xef9   :  { %v1933_v54 = vadd.f32 %v3666_v52, %v3351_v30 }
 0xefa   :  { %v1924_v55 = vpop.f32.mrf.mxu1 }
 0xefb   :  { %v4885_v56 = vpack.c.bf16 %v1933_v54, %v1930_v34  ;;  %v1925_v57 = vadd.f32 %v3351_v30, %v1924_v55 }
 0xefd   :  { %v4887_v28 = vpack.c.bf16 %v1925_v57, %v1922_v53  ;;  %3686 = vmatpush3.bf16.msra.mxu1 %v4885_v56 }
 0xefe   :  { %3697 = vmatprep.subr.bf16.mxu1 %v4389_v0 }
 0xeff   :  { %3680 = vmatpush3.bf16.msra.mxu0 %v4887_v28 }
 0xf00   :  { %3691 = vmatprep.subr.bf16.mxu0 %v4389_v0 }
 0xfb1   :  { %v1982_v48 = vpop.f32.mrf.mxu0 }
 0xfb2   :  { %v2035_v58 = vsel %vm2034_vm4, %v1982_v48, -inf }
 0xfb3   :  { %2036 = vmax.xlane.f32.xlu0 %v2035_v58  ;;  %v3671_v59 = vpop.f32.mrf.mxu0 }
 0xfb5   :  { %v1985_v33 = vpop.f32.mrf.mxu0  ;;  %v2028_v22 = vpop.f32.mrf.mxu1 }
 0xfb6   :  { %v2038_v60 = vsel %vm2034_vm4, %v2028_v22, -inf }
 0xfb7   :  { %2039 = vmax.xlane.f32.xlu1 %v2038_v60  ;;  %v3672_v61 = vpop.f32.mrf.mxu0  ;;  %v3677_v43 = vpop.f32.mrf.mxu1 }
 0xfb9   :  { %v2031_v62 = vpop.f32.mrf.mxu1 }
 0xfbb   :  { %v3678_v63 = vpop.f32.mrf.mxu1 }
 0xfc8   :  { %2202 = vrot.lane.b32.xlu1 %v4863_v35, %s4391_s3 }
0x103c   :  { %v2037_v1 = vpop.xlane.xlu0 %2036 }
0x103d   :  { %v2041_v2 = vsub.f32 %v1982_v48, %v2037_v1 }
0x103f   :  { %v2043_v3 = vmul.f32 1.442695, %v2041_v2 }
0x1040   :  { %v2040_v42 = vpop.xlane.xlu1 %2039 }
0x1041   :  { %3918 = vpow2.f32 %v2043_v3  ;;  %v2042_v4 = vsub.f32 %v2028_v22, %v2040_v42 }
0x1043   :  { %v2045_v9 = vmul.f32 1.442695, %v2042_v4 }
0x1044   :  { %v2203_v14 = vpop.permute.xlu1 %2202 }
0x1045   :  { %3920 = vpow2.f32 %v2045_v9  ;;  %v2208_v25 = vsel %vm570_vm2, %v2203_v14, 0 }
0x104e   :  { %v3919_v10 = vpop.eup %3918 }
0x104f   :  { %v2047_v11 = vsel %vm2034_vm4, %v3919_v10, 0.0 }
0x1050   :  { %2048 = vadd.xlane.f32.xlu0 %v2047_v11 }
0x1052   :  { %v3921_v12 = vpop.eup %3920 }
0x1053   :  { %v2050_v13 = vsel %vm2034_vm4, %v3921_v12, 0.0 }
0x1054   :  { %2051 = vadd.xlane.f32.xlu1 %v2050_v13 }
0x1065   :  { %2147 = vrot.lane.b32.xlu1 %v4873_v46, %s4391_s3 }
0x1066   :  { %2150 = vrot.lane.b32.xlu0 %v4865_v37, %s4391_s3 }
0x1069   :  { %2199 = vrot.lane.b32.xlu1 %v4879_v6, %s4391_s3 }
0x10d9   :  { %v2049_v31 = vpop.xlane.xlu0 %2048 }
0x10da   :  { %3922 = vrcp.f32 %v2049_v31 }
0x10dd   :  { %v2052_v17 = vpop.xlane.xlu1 %2051  ;;  %v2151_v20 = vpop.permute.xlu0 %2150 }
0x10de   :  { %3924 = vrcp.f32 %v2052_v17  ;;  %v2156_v7 = vsel %vm570_vm2, %v2151_v20, 0 }
0x10e1   :  { %v2148_v26 = vpop.permute.xlu1 %2147 }
0x10e5   :  { %v2200_v27 = vpop.permute.xlu1 %2199 }
0x10e7   :  { %v3923_v18 = vpop.eup %3922 }
0x10e8   :  { %v2055_v19 = vmul.f32 %v3923_v18, %v3919_v10  ;;  %v1718_v10 = vld [vmem:[#allocation26] sm:$0xf] }
0x10e9   :  { %v2420_v13 = vsel %vm690_vm3, %v1718_v10, 0 }
0x10ea   :  { %v2057_v21 = vpack.c.bf16 %v2055_v19, %v2055_v19  ;;  %v1719_v19 = vld [vmem:[#allocation26 + $0x4] sm:$0xf] }
0x10eb   :  { %v3925_v23 = vpop.eup %3924  ;;  %v2373_v20 = vsel %vm690_vm3, %v1719_v19, 0 }
0x10ec   :  { %3682 = vmatmul.mubr.msk.bf16.vlgmr.msra.gmra.mxu0 %vm2034_vm4, %v2057_v21  ;;  %v2056_v8 = vmul.f32 %v3925_v23, %v3921_v12 }
0x10ed   :  { %3692 = vmatpush3.bf16.xpose.msra.mxu0 %v2156_v7  ;;  %3693 = vmatprep.mubr.msk.bf16.mxu0 %vm4390_vm0, %v4389_v0 }
0x10ee   :  { %v2058_v24 = vpack.c.bf16 %v2056_v8, %v2056_v8  ;;  %3703 = vmatprep.subr.bf16.mxu0 %v4389_v0 }
0x10f0   :  { %3688 = vmatmul.mubr.msk.bf16.vlgmr.msra.gmra.mxu1 %vm2034_vm4, %v2058_v24 }
0x10f1   :  { %3698 = vmatpush3.bf16.xpose.msra.mxu1 %v2208_v25  ;;  %3699 = vmatprep.mubr.msk.bf16.mxu1 %vm4390_vm0, %v4389_v0 }
0x10f2   :  { %3709 = vmatprep.subr.bf16.mxu1 %v4389_v0 }
0x10f4   :  { %3694 = vmatmul.mubr.msk.bf16.vlgmr.msra.gmra.mxu0 %vm570_vm2, %v2148_v26 }
0x10f5   :  { %3705 = vmatprep.mubr.msk.bf16.mxu0 %vm4390_vm0, %v4389_v0 }
0x10f8   :  { %3700 = vmatmul.mubr.msk.bf16.vlgmr.msra.gmra.mxu1 %vm570_vm2, %v2200_v27 }
0x10f9   :  { %3711 = vmatprep.mubr.msk.bf16.mxu1 %vm4390_vm0, %v4389_v0 }
0x11ac   :  { %v4921_v29 = vpop.f32.mrf.mxu0 }
0x11ae   :  { %v3683_v32 = vpop.f32.mrf.mxu0 }
0x11b0   :  { %v2099_v36 = vpop.f32.mrf.mxu0  ;;  %v4923_v38 = vpop.f32.mrf.mxu1 }
0x11b1   :  { %v2145_v39 = vpack.c.bf16 %v4923_v38, %v4921_v29 }
0x11b2   :  { %v3684_v40 = vpop.f32.mrf.mxu0  ;;  %v3689_v41 = vpop.f32.mrf.mxu1 }
0x11b4   :  { %v2142_v44 = vpop.f32.mrf.mxu1  ;;  %v2192_v45 = vpop.f32.mrf.mxu0 }
0x11b5   :  { %v2250_v5 = vsel %vm2034_vm4, %v2192_v45, -inf }
0x11b6   :  { %v3690_v47 = vpop.f32.mrf.mxu1  ;;  %2251 = vmax.xlane.f32.xlu0 %v2250_v5  ;;  %v3695_v49 = vpop.f32.mrf.mxu0 }
0x11b8   :  { %v2195_v50 = vpop.f32.mrf.mxu0  ;;  %v2244_v30 = vpop.f32.mrf.mxu1 }
0x11b9   :  { %v2253_v51 = vsel %vm2034_vm4, %v2244_v30, -inf }
0x11ba   :  { %2254 = vmax.xlane.f32.xlu1 %v2253_v51  ;;  %v3696_v34 = vpop.f32.mrf.mxu0  ;;  %v3701_v52 = vpop.f32.mrf.mxu1 }
0x11bc   :  { %v2247_v53 = vpop.f32.mrf.mxu1 }
0x11be   :  { %v3702_v54 = vpop.f32.mrf.mxu1 }
0x11cb   :  { %2322 = vrot.lane.b32.xlu1 %v4885_v56, %s4391_s3 }
0x11cf   :  { %2465 = vrot.lane.b32.xlu1 %v4865_v37, %s4392_s2 }
0x11d3   :  { %2515 = vrot.lane.b32.xlu1 %v4863_v35, %s4392_s2 }
0x11d7   :  { %2513 = vrot.lane.b32.xlu1 %v4879_v6, %s4392_s2 }
0x123f   :  { %v2252_v55 = vpop.xlane.xlu0 %2251 }
0x1240   :  { %v2256_v57 = vsub.f32 %v2192_v45, %v2252_v55 }
0x1242   :  { %v2258_v48 = vmul.f32 1.442695, %v2256_v57 }
0x1243   :  { %v2255_v58 = vpop.xlane.xlu1 %2254 }
0x1244   :  { %3926 = vpow2.f32 %v2258_v48  ;;  %v2257_v59 = vsub.f32 %v2244_v30, %v2255_v58 }
0x1246   :  { %v2260_v33 = vmul.f32 1.442695, %v2257_v59 }
0x1247   :  { %v2323_v22 = vpop.permute.xlu1 %2322 }
0x1248   :  { %3928 = vpow2.f32 %v2260_v33  ;;  %3710 = vmatpush3.bf16.msra.mxu1 %v2323_v22 }
0x1249   :  { %3721 = vmatprep.subr.bf16.mxu1 %v4389_v0 }
0x124b   :  { %v2466_v14 = vpop.permute.xlu1 %2465 }
0x124c   :  { %v2471_v27 = vsel %vm570_vm2, %v2466_v14, 0 }
0x124f   :  { %v2516_v31 = vpop.permute.xlu1 %2515 }
0x1250   :  { %v2521_v17 = vsel %vm570_vm2, %v2516_v31, 0 }
0x1251   :  { %v3927_v60 = vpop.eup %3926 }
0x1252   :  { %v2262_v61 = vsel %vm2034_vm4, %v3927_v60, 0.0 }
0x1253   :  { %2263 = vadd.xlane.f32.xlu0 %v2262_v61  ;;  %v2514_v18 = vpop.permute.xlu1 %2513 }
0x1255   :  { %v3929_v43 = vpop.eup %3928 }
0x1256   :  { %v2265_v62 = vsel %vm2034_vm4, %v3929_v43, 0.0 }
0x1257   :  { %2266 = vadd.xlane.f32.xlu0 %v2265_v62 }
0x126d   :  { %2275 = vrot.lane.b32.xlu0 %v4887_v28, %s4391_s3 }
0x1271   :  { %2463 = vrot.lane.b32.xlu0 %v4873_v46, %s4392_s2 }
0x12dc   :  { %v2264_v63 = vpop.xlane.xlu0 %2263 }
0x12dd   :  { %3930 = vrcp.f32 %v2264_v63 }
0x12e0   :  { %v2267_v1 = vpop.xlane.xlu0 %2266 }
0x12e1   :  { %3932 = vrcp.f32 %v2267_v1 }
0x12e4   :  { %v2276_v2 = vpop.permute.xlu0 %2275 }
0x12e5   :  { %3704 = vmatpush3.bf16.msra.mxu0 %v2276_v2 }
0x12e6   :  { %3715 = vmatprep.subr.bf16.mxu0 %v4389_v0 }
0x12e8   :  { %v2464_v38 = vpop.permute.xlu0 %2463 }
0x12ea   :  { %v3931_v3 = vpop.eup %3930 }
0x12eb   :  { %v2270_v42 = vmul.f32 %v3931_v3, %v3927_v60 }
0x12ed   :  { %v2272_v4 = vpack.c.bf16 %v2270_v42, %v2270_v42 }
0x12ee   :  { %v3933_v9 = vpop.eup %3932 }
0x12ef   :  { %3706 = vmatmul.mubr.msk.bf16.vlgmr.msra.gmra.mxu0 %vm2034_vm4, %v2272_v4  ;;  %v2271_v11 = vmul.f32 %v3933_v9, %v3929_v43 }
0x12f0   :  { %3717 = vmatprep.mubr.msk.bf16.mxu0 %vm4390_vm0, %v4389_v0  ;;  %3716 = vmatpush3.bf16.msra.mxu0 %v2373_v20 }
0x12f1   :  { %v2273_v12 = vpack.c.bf16 %v2271_v11, %v2271_v11  ;;  %3727 = vmatprep.subr.bf16.mxu0 %v4389_v0 }
0x12f3   :  { %3712 = vmatmul.mubr.msk.bf16.vlgmr.msra.gmra.mxu1 %vm2034_vm4, %v2273_v12 }
0x12f4   :  { %3722 = vmatpush3.bf16.msra.mxu1 %v2420_v13  ;;  %3723 = vmatprep.mubr.msk.bf16.mxu1 %vm4390_vm0, %v4389_v0 }
0x12f5   :  { %3733 = vmatprep.subr.bf16.mxu1 %v4389_v0 }
0x12fb   :  { %3724 = vmatmul.mubr.msk.bf16.vlgmr.msra.gmra.mxu1 %vm570_vm2, %v2145_v39 }
0x12fc   :  { %3734 = vmatpush3.bf16.xpose.msra.mxu1 %v2521_v17  ;;  %3735 = vmatprep.mubr.msk.bf16.mxu1 %vm4390_vm0, %v4389_v0 }
0x12fd   :  { %3745 = vmatprep.subr.bf16.mxu1 %v4389_v0 }
0x1303   :  { %3736 = vmatmul.mubr.msk.bf16.vlgmr.msra.gmra.mxu1 %vm570_vm2, %v2514_v18  ;;  %v1720_v18 = vld [vmem:[#allocation26 + $0x8] sm:$0xf] }
0x1304   :  { %3747 = vmatprep.mubr.msk.bf16.mxu1 %vm4390_vm0, %v4389_v0  ;;  %v2684_v19 = vsel %vm690_vm3, %v1720_v18, 0 }
0x13af   :  { %v2315_v21 = vpop.f32.mrf.mxu0 }
0x13b1   :  { %v3707_v23 = vpop.f32.mrf.mxu0 }
0x13b3   :  { %v2318_v7 = vpop.f32.mrf.mxu0  ;;  %v2362_v8 = vpop.f32.mrf.mxu1 }
0x13b4   :  { %v2368_v24 = vpack.c.bf16 %v2362_v8, %v2315_v21 }
0x13b5   :  { %v3708_v25 = vpop.f32.mrf.mxu0  ;;  %v3713_v26 = vpop.f32.mrf.mxu1 }
0x13b6   :  { %3718 = vmatmul.mubr.msk.bf16.vlgmr.msra.gmra.mxu0 %vm570_vm2, %v2368_v24 }
0x13b7   :  { %3728 = vmatpush3.bf16.xpose.msra.mxu0 %v2471_v27  ;;  %v2365_v29 = vpop.f32.mrf.mxu1  ;;  %3729 = vmatprep.mubr.msk.bf16.mxu0 %vm4390_vm0, %v4389_v0 }
0x13b8   :  { %3739 = vmatprep.subr.bf16.mxu0 %v4389_v0 }
0x13b9   :  { %v3714_v32 = vpop.f32.mrf.mxu1 }
0x13bb   :  { %v4971_v36 = vpop.f32.mrf.mxu1 }
0x13bd   :  { %v3725_v39 = vpop.f32.mrf.mxu1 }
0x13be   :  { %3730 = vmatmul.mubr.msk.bf16.vlgmr.msra.gmra.mxu0 %vm570_vm2, %v2464_v38 }
0x13bf   :  { %v4974_v40 = vpop.f32.mrf.mxu1  ;;  %3741 = vmatprep.mubr.msk.bf16.mxu0 %vm4390_vm0, %v4389_v0 }
0x13c1   :  { %v3726_v41 = vpop.f32.mrf.mxu1 }
0x13c3   :  { %v2557_v44 = vpop.f32.mrf.mxu1 }
0x13c4   :  { %v2566_v45 = vsel %vm2034_vm4, %v2557_v44, -inf }
0x13c5   :  { %2567 = vmax.xlane.f32.xlu1 %v2566_v45  ;;  %v3737_v5 = vpop.f32.mrf.mxu1 }
0x13c7   :  { %v2560_v47 = vpop.f32.mrf.mxu1 }
0x13c9   :  { %v3738_v49 = vpop.f32.mrf.mxu1 }
0x13d6   :  { %2633 = vrot.lane.b32.xlu1 %v4885_v56, %s4392_s2 }
0x13da   :  { %2731 = vrot.lane.b32.xlu1 %v4865_v37, %s4393_s7 }
0x13de   :  { %2781 = vrot.lane.b32.xlu1 %v4863_v35, %s4393_s7 }
0x13e2   :  { %2779 = vrot.lane.b32.xlu1 %v4879_v6, %s4393_s7 }
0x144e   :  { %v2568_v50 = vpop.xlane.xlu1 %2567 }
0x144f   :  { %v2570_v51 = vsub.f32 %v2557_v44, %v2568_v50 }
0x1451   :  { %v2573_v34 = vmul.f32 1.442695, %v2570_v51 }
0x1452   :  { %v2634_v30 = vpop.permute.xlu1 %2633 }
0x1453   :  { %3746 = vmatpush3.bf16.msra.mxu1 %v2634_v30  ;;  %3934 = vpow2.f32 %v2573_v34 }
0x1454   :  { %3757 = vmatprep.subr.bf16.mxu1 %v4389_v0 }
0x1456   :  { %v2732_v2 = vpop.permute.xlu1 %2731 }
0x1457   :  { %v2737_v42 = vsel %vm570_vm2, %v2732_v2, 0 }
0x145a   :  { %v2782_v24 = vpop.permute.xlu1 %2781 }
0x145b   :  { %v2787_v29 = vsel %vm570_vm2, %v2782_v24, 0 }
0x145e   :  { %v2780_v39 = vpop.permute.xlu1 %2779 }
0x1460   :  { %v3935_v57 = vpop.eup %3934 }
0x1461   :  { %v2578_v58 = vsel %vm2034_vm4, %v3935_v57, 0.0 }
0x1476   :  { %v4988_v52 = vpop.f32.mrf.mxu0 }
0x1477   :  { %v2457_v49 = vadd.f32 %v4971_v36, %v4988_v52 }
0x1478   :  { %v3719_v53 = vpop.f32.mrf.mxu0 }
0x147a   :  { %v4990_v54 = vpop.f32.mrf.mxu0 }
0x147b   :  { %v2460_v34 = vadd.f32 %v4974_v40, %v4990_v54 }
0x147c   :  { %v3720_v37 = vpop.f32.mrf.mxu0 }
0x147e   :  { %v2507_v55 = vpop.f32.mrf.mxu0 }
0x147f   :  { %v2563_v35 = vsel %vm2034_vm4, %v2507_v55, -inf }
0x1480   :  { %2564 = vmax.xlane.f32.xlu0 %v2563_v35  ;;  %v3731_v6 = vpop.f32.mrf.mxu0 }
0x1482   :  { %v2510_v48 = vpop.f32.mrf.mxu0 }
0x1484   :  { %2579 = vadd.xlane.f32.xlu0 %v2578_v58  ;;  %v3732_v59 = vpop.f32.mrf.mxu0 }
0x1509   :  { %v2565_v33 = vpop.xlane.xlu0 %2564 }
0x150a   :  { %v2569_v22 = vsub.f32 %v2507_v55, %v2565_v33 }
0x150c   :  { %v2571_v60 = vmul.f32 1.442695, %v2569_v22 }
0x150d   :  { %v2580_v61 = vpop.xlane.xlu0 %2579 }
0x150e   :  { %3936 = vpow2.f32 %v2571_v60 }
0x150f   :  { %3938 = vrcp.f32 %v2580_v61 }
0x151b   :  { %v3937_v43 = vpop.eup %3936 }
0x151c   :  { %v3939_v62 = vpop.eup %3938  ;;  %v2575_v63 = vsel %vm2034_vm4, %v3937_v43, 0.0 }
0x151d   :  { %2576 = vadd.xlane.f32.xlu0 %v2575_v63  ;;  %v2584_v1 = vmul.f32 %v3939_v62, %v3935_v57 }
0x151f   :  { %v2586_v3 = vpack.c.bf16 %v2584_v1, %v2584_v1 }
0x1521   :  { %3748 = vmatmul.mubr.msk.bf16.vlgmr.msra.gmra.mxu1 %vm2034_vm4, %v2586_v3 }
0x1522   :  { %3758 = vmatpush3.bf16.xpose.msra.mxu1 %v2737_v42  ;;  %3759 = vmatprep.mubr.msk.bf16.mxu1 %vm4390_vm0, %v4389_v0 }
0x1523   :  { %3769 = vmatprep.subr.bf16.mxu1 %v4389_v0 }
0x1533   :  { %2587 = vrot.lane.b32.xlu0 %v4887_v28, %s4392_s2 }
0x1537   :  { %2729 = vrot.lane.b32.xlu0 %v4873_v46, %s4393_s7 }
0x15a6   :  { %v2577_v4 = vpop.xlane.xlu0 %2576 }
0x15a7   :  { %3940 = vrcp.f32 %v2577_v4 }
0x15aa   :  { %v2588_v9 = vpop.permute.xlu0 %2587 }
0x15ab   :  { %3740 = vmatpush3.bf16.msra.mxu0 %v2588_v9 }
0x15ac   :  { %3751 = vmatprep.subr.bf16.mxu0 %v4389_v0 }
0x15ae   :  { %v2730_v10 = vpop.permute.xlu0 %2729 }
0x15af   :  { %3760 = vmatmul.mubr.msk.bf16.vlgmr.msra.gmra.mxu1 %vm570_vm2, %v2730_v10 }
0x15b0   :  { %3771 = vmatprep.mubr.msk.bf16.mxu1 %vm4390_vm0, %v4389_v0 }
0x15b4   :  { %v3941_v11 = vpop.eup %3940 }
0x15b5   :  { %v2583_v12 = vmul.f32 %v3941_v11, %v3937_v43 }
0x15b7   :  { %v2585_v13 = vpack.c.bf16 %v2583_v12, %v2583_v12 }
0x15b9   :  { %3742 = vmatmul.mubr.msk.bf16.vlgmr.msra.gmra.mxu0 %vm2034_vm4, %v2585_v13 }
0x15ba   :  { %3753 = vmatprep.mubr.msk.bf16.mxu0 %vm4390_vm0, %v4389_v0  ;;  %3752 = vmatpush3.bf16.msra.mxu0 %v2684_v19 }
0x15bb   :  { %3763 = vmatprep.subr.bf16.mxu0 %v4389_v0 }
0x15e1   :  { %v2673_v46 = vpop.f32.mrf.mxu1 }
0x15e3   :  { %v3749_v14 = vpop.f32.mrf.mxu1 }
0x15e5   :  { %v2676_v31 = vpop.f32.mrf.mxu1 }
0x15e6   :  { %v3376_v31 = vld [vmem:[%s5104_s29] ss:$0 sm:$0xff] }
0x15e7   :  { %v3750_v17 = vpop.f32.mrf.mxu1 }
0x166f   :  { %v2773_v20 = vpop.f32.mrf.mxu1 }
0x1670   :  { %v2829_v21 = vsel %vm2034_vm4, %v2773_v20, -inf }
0x1671   :  { %2830 = vmax.xlane.f32.xlu0 %v2829_v21  ;;  %v3761_v23 = vpop.f32.mrf.mxu1 }
0x1673   :  { %v2776_v7 = vpop.f32.mrf.mxu1 }
0x1675   :  { %v3762_v8 = vpop.f32.mrf.mxu1 }
0x1679   :  { %v2627_v25 = vpop.f32.mrf.mxu0 }
0x167a   :  { %v2679_v26 = vpack.c.bf16 %v2673_v46, %v2627_v25 }
0x167b   :  { %v3743_v27 = vpop.f32.mrf.mxu0 }
0x167c   :  { %3754 = vmatmul.mubr.msk.bf16.vlgmr.msra.gmra.mxu0 %vm570_vm2, %v2679_v26 }
0x167d   :  { %3764 = vmatpush3.bf16.xpose.msra.mxu0 %v2787_v29  ;;  %v2630_v32 = vpop.f32.mrf.mxu0  ;;  %3765 = vmatprep.mubr.msk.bf16.mxu0 %vm4390_vm0, %v4389_v0 }
0x167e   :  { %3775 = vmatprep.subr.bf16.mxu0 %v4389_v0 }
0x167f   :  { %v3744_v38 = vpop.f32.mrf.mxu0 }
0x1684   :  { %3766 = vmatmul.mubr.msk.bf16.vlgmr.msra.gmra.mxu0 %vm570_vm2, %v2780_v39 }
0x1685   :  { %3777 = vmatprep.mubr.msk.bf16.mxu0 %vm4390_vm0, %v4389_v0 }
0x16fa   :  { %v2831_v41 = vpop.xlane.xlu0 %2830 }
0x16fb   :  { %v2835_v44 = vsub.f32 %v2773_v20, %v2831_v41 }
0x16fd   :  { %v2837_v45 = vmul.f32 1.442695, %v2835_v44 }
0x16ff   :  { %3942 = vpow2.f32 %v2837_v45 }
0x170c   :  { %v3943_v5 = vpop.eup %3942 }
0x170d   :  { %v2841_v47 = vsel %vm2034_vm4, %v3943_v5, 0.0 }
0x170e   :  { %2842 = vadd.xlane.f32.xlu0 %v2841_v47 }
0x173c   :  { %v2720_v50 = vpop.f32.mrf.mxu0 }
0x173d   :  { %v2727_v30 = vadd.f32 %v2720_v50, %v2457_v49  ;;  %v3876_v49 = vld [vmem:[#allocation28 + $0x8] sm:$0xff]  }
0x173e   :  { %v3755_v51 = vpop.f32.mrf.mxu0  ;;  %v3878_v50 = vld [vmem:[%s5105_s18 + $0x18] sm:$0xff]  }
0x1740   :  { %v2723_v53 = vpop.f32.mrf.mxu0 }
0x1741   :  { %v2728_v37 = vadd.f32 %v2723_v53, %v2460_v34 }
0x1742   :  { %v3756_v55 = vpop.f32.mrf.mxu0 }
0x1744   :  { %v2823_v35 = vpop.f32.mrf.mxu0 }
0x1745   :  { %v2832_v57 = vsel %vm2034_vm4, %v2823_v35, -inf }
0x1746   :  { %2833 = vmax.xlane.f32.xlu1 %v2832_v57  ;;  %v3767_v6 = vpop.f32.mrf.mxu0 }
0x1747   :  { %v3377_v6 = vld [vmem:[%s5106_s30] ss:$0 sm:$0xff] }
0x1748   :  { %v2826_v48 = vpop.f32.mrf.mxu0 }
0x174a   :  { %v3768_v58 = vpop.f32.mrf.mxu0 }
0x1757   :  { %2899 = vrot.lane.b32.xlu1 %v4885_v56, %s4393_s7 }
0x1797   :  { %v2843_v22 = vpop.xlane.xlu0 %2842 }
0x17cf   :  { %v2834_v36 = vpop.xlane.xlu1 %2833 }
0x17d0   :  { %v2836_v52 = vsub.f32 %v2823_v35, %v2834_v36 }
0x17d2   :  { %v2839_v59 = vmul.f32 1.442695, %v2836_v52  ;;  %v3378_v52 = vld [vmem:[%s4538_s19] ss:$0 sm:$0xff]  ;;  %s4394_s19 = smov [#allocation29]  }
0x17d3   :  { %v2900_v33 = vpop.permute.xlu1 %2899  ;;  %s3257_s17 = sshll.u32 %s4394_s19, 4  ;;  %s3258_s17 = int_to_ptr.vmem [resolvable:$true] %s3257_s17 }
0x17d4   :  { %3944 = vpow2.f32 %v2839_v59  ;;  %3776 = vmatpush3.bf16.msra.mxu0 %v2900_v33  ;;  %s4298_s16 = scalar_lea.vmem %s3258_s17, 256  ;;  %p4303_p2 = scmp.lt.s32.totalorder %s3258_s17, %s3258_s17 }
0x17d5   :  { %3787 = vmatprep.subr.bf16.mxu0 %v4389_v0  ;;  %3946 = vrcp.f32 %v2843_v22  ;;  %v3879_v22 = vld [vmem:[%s5105_s18 + $0x10] sm:$0xff]   ;;  %p4299_p1 = scmp.ne.s32.totalorder %s3258_s17, %s4298_s16  ;;  %p4304_p3 = scmp.lt.s32.totalorder %s4298_s16, %s4298_s16 }
0x17d7   :  { %p4305_p4 = por %p4304_p3, %p4303_p2 }
0x17d9   :  { %p4306_p5 = pnand %p4305_p4, %p4299_p1 }
0x17e1   :  { %v3945_v40 = vpop.eup %3944 }
0x17e2   :  { %v2844_v54 = vsel %vm2034_vm4, %v3945_v40, 0.0  ;;  %v3947_v60 = vpop.eup %3946 }
0x17e3   :  { %2845 = vadd.xlane.f32.xlu0 %v2844_v54  ;;  %v2849_v56 = vmul.f32 %v3947_v60, %v3943_v5  ;;  %v3880_v60 = vld [vmem:[%s5105_s18 + $0x8] sm:$0xff]  }
0x17e5   :  { %v2851_v62 = vpack.c.bf16 %v2849_v56, %v2849_v56  ;;  %v3379_v56 = vld [vmem:[%s5107_s8] ss:$0 sm:$0xff] }
0x17f9   :  { %2853 = vrot.lane.b32.xlu0 %v4887_v28, %s4393_s7  ;;  %v1721_v28 = vld [vmem:[#allocation26 + $0xc] sm:$0xf] }
0x17fa   :  { %v2950_v3 = vsel %vm690_vm3, %v1721_v28, 0 }
0x186c   :  { %v2846_v61 = vpop.xlane.xlu0 %2845 }
0x186d   :  { %3948 = vrcp.f32 %v2846_v61  ;;  %v3881_v61 = vld [vmem:[%s5105_s18] sm:$0xff]  }
0x1870   :  { %v2854_v43 = vpop.permute.xlu0 %2853 }
0x1871   :  { %3770 = vmatpush3.bf16.msra.mxu1 %v2854_v43 }
0x1872   :  { %3781 = vmatprep.subr.bf16.mxu1 %v4389_v0 }
0x1874   :  { %3772 = vmatmul.mubr.msk.bf16.vlgmr.msra.gmra.mxu1 %vm2034_vm4, %v2851_v62 }
0x1875   :  { %3783 = vmatprep.mubr.msk.bf16.mxu1 %vm4390_vm0, %v4389_v0  ;;  %3782 = vmatpush3.bf16.msra.mxu1 %v2950_v3 }
0x1876   :  { %3795 = vmatprep.subr.bf16.mxu1 %v4389_v0 }
0x187a   :  { %v3949_v63 = vpop.eup %3948 }
0x187b   :  { %v2850_v1 = vmul.f32 %v3949_v63, %v3945_v40 }
0x187d   :  { %v2852_v2 = vpack.c.bf16 %v2850_v1, %v2850_v1 }
0x187f   :  { %3778 = vmatmul.mubr.msk.bf16.vlgmr.msra.gmra.mxu0 %vm2034_vm4, %v2852_v2 }
0x1880   :  { %3791 = vmatprep.mubr.msk.bf16.mxu0 %vm4390_vm0, %v4389_v0  ;;  %3788 = vmatpush3.bf16.msra.mxu0 %v3876_v49 }
0x1881   :  { %3789 = vmatprep.subr.bf16.mxu0 %v4389_v0 }
0x1934   :  { %v2893_v42 = vpop.f32.mrf.mxu1 }
0x1936   :  { %v3773_v4 = vpop.f32.mrf.mxu1 }
0x1938   :  { %v2896_v9 = vpop.f32.mrf.mxu1 }
0x1939   :  { %v3383_v9 = vld [vmem:[%s5108_s12] ss:$0 sm:$0xff] }
0x193a   :  { %v3774_v10 = vpop.f32.mrf.mxu1 }
0x193f   :  { %v2939_v11 = vpop.f32.mrf.mxu0 }
0x1940   :  { %v2945_v12 = vpack.c.bf16 %v2939_v11, %v2893_v42 }
0x1941   :  { %v3779_v13 = vpop.f32.mrf.mxu0 }
0x1942   :  { %3784 = vmatmul.mubr.msk.bf16.vlgmr.msra.gmra.mxu1 %vm570_vm2, %v2945_v12 }
0x1943   :  { %v2942_v46 = vpop.f32.mrf.mxu0  ;;  %3803 = vmatprep.mubr.msk.bf16.mxu1 %vm4390_vm0, %v4389_v0  ;;  %3796 = vmatpush3.bf16.msra.mxu1 %v3878_v50 }
0x1944   :  { %3797 = vmatprep.subr.bf16.mxu1 %v4389_v0 }
0x1945   :  { %v3780_v14 = vpop.f32.mrf.mxu0 }
0x1947   :  { %3798 = vmatpush3.bf16.msra.mxu1 %v3879_v22 }
0x1948   :  { %3799 = vmatprep.subr.bf16.mxu1 %v4389_v0 }
0x194b   :  { %3800 = vmatpush3.bf16.msra.mxu1 %v3880_v60 }
0x194c   :  { %3801 = vmatprep.subr.bf16.mxu1 %v4389_v0 }
0x194f   :  { %3802 = vmatpush3.bf16.msra.mxu1 %v3881_v61 }
0x1a02   :  { %v2986_v17 = vpop.f32.mrf.mxu1 }
0x1a03   :  { %v2993_v18 = vadd.f32 %v2986_v17, %v2727_v30 }
0x1a04   :  { %v3785_v19 = vpop.f32.mrf.mxu1 }
0x1a05   :  { %v3001_v20 = vadd.f32 %v3376_v31, %v2993_v18 }
0x1a06   :  { %v2989_v21 = vpop.f32.mrf.mxu1 }
0x1a07   :  { %v2994_v23 = vadd.f32 %v2989_v21, %v2728_v37  ;;  %v3003_v7 = vadd.f32 %v3001_v20, %v4849_v15 }
0x1a08   :  { %v3786_v8 = vpop.f32.mrf.mxu1 }
0x1a09   :  { %v3002_v24 = vadd.f32 %v3376_v31, %v2994_v23  ;;  %v3007_v25 = vsel %vm398_vm1, %v3003_v7, 0.0 }
0x1a0a   :  { %3008 = vadd.xlane.f32.xlu1 %v3007_v25 }
0x1a0b   :  { %v3004_v26 = vadd.f32 %v3002_v24, %v4851_v16  ;;  %v3877_v16 = vld [vmem:[#allocation28] sm:$0xff]  }
0x1a0c   :  { %3790 = vmatpush3.bf16.msra.mxu0 %v3877_v16 }
0x1a0d   :  { %v3010_v27 = vsel %vm398_vm1, %v3004_v26, 0.0 }
0x1a0e   :  { %3011 = vadd.xlane.f32.xlu0 %v3010_v27 }
0x1a93   :  { %v3009_v29 = vpop.xlane.xlu1 %3008 }
0x1a94   :  { %v3013_v32 = vmul.f32 0.03125, %v3009_v29 }
0x1a96   :  { %v3015_v38 = vsub.f32 %v3003_v7, %v3013_v32 }
0x1a97   :  { %v3012_v39 = vpop.xlane.xlu0 %3011 }
0x1a98   :  { %v3014_v41 = vmul.f32 0.03125, %v3012_v39  ;;  %v3017_v44 = vmul.f32 %v3015_v38, %v3015_v38 }
0x1a9a   :  { %v3016_v45 = vsub.f32 %v3004_v26, %v3014_v41  ;;  %v3019_v15 = vsel %vm398_vm1, %v3017_v44, 0.0 }
0x1a9b   :  { %3020 = vadd.xlane.f32.xlu0 %v3019_v15  ;;  %v3389_v15 = vld [vmem:[%s4543_s5] ss:$0 sm:$0xff] }
0x1a9c   :  { %v3018_v5 = vmul.f32 %v3016_v45, %v3016_v45 }
0x1a9e   :  { %v3022_v47 = vsel %vm398_vm1, %v3018_v5, 0.0 }
0x1a9f   :  { %3023 = vadd.xlane.f32.xlu1 %v3022_v47  ;;  %v3390_v47 = vld [vmem:[%s4548_s4] ss:$0 sm:$0xff] }
0x1b24   :  { %v3021_v30 = vpop.xlane.xlu0 %3020 }
0x1b25   :  { %v3025_v51 = vmul.f32 0.03125, %v3021_v30 }
0x1b27   :  { %v3027_v34 = vadd.f32 1e-05, %v3025_v51 }
0x1b28   :  { %v3024_v53 = vpop.xlane.xlu1 %3023 }
0x1b29   :  { %3950 = vrsqrt.f32 %v3027_v34  ;;  %v3026_v37 = vmul.f32 0.03125, %v3024_v53 }
0x1b2b   :  { %v3028_v55 = vadd.f32 1e-05, %v3026_v37 }
0x1b2d   :  { %3952 = vrsqrt.f32 %v3028_v55 }
0x1b36   :  { %v3951_v35 = vpop.eup %3950 }
0x1b37   :  { %v3031_v57 = vmul.f32 %v3951_v35, %v3015_v38 }
0x1b39   :  { %v3039_v36 = vmul.f32 %v3377_v6, %v3031_v57 }
0x1b3a   :  { %v3953_v48 = vpop.eup %3952 }
0x1b3b   :  { %v3032_v58 = vmul.f32 %v3953_v48, %v3016_v45  ;;  %v3047_v33 = vadd.f32 %v3378_v52, %v3039_v36 }
0x1b3d   :  { %v3040_v59 = vmul.f32 %v3377_v6, %v3032_v58 }
0x1b3f   :  { %v3048_v40 = vadd.f32 %v3378_v52, %v3040_v59 }
0x1b41   :  { %v3049_v54 = vpack.c.bf16 %v3048_v40, %v3047_v33 }
0x1b43   :  { %3792 = vmatmul.mubr.msk.bf16.vlgmr.msra.gmra.mxu0 %vm398_vm1, %v3049_v54 }
0x1c03   :  { %v3110_v43 = vpop.f32.mrf.mxu0 }
0x1c04   :  { %v3111_v63 = vadd.f32 %v3379_v56, %v3110_v43 }
0x1c05   :  { %v3793_v62 = vpop.f32.mrf.mxu0 }
0x1c06   :  { %v3117_v3 = vmax.f32 %v3111_v63, 0.0 }
0x1c07   :  { %v3113_v1 = vpop.f32.mrf.mxu0 }
0x1c08   :  { %v3114_v2 = vadd.f32 %v3379_v56, %v3113_v1 }
0x1c09   :  { %v3794_v28 = vpop.f32.mrf.mxu0 }
0x1c0a   :  { %v3118_v42 = vmax.f32 %v3114_v2, 0.0 }
0x1c0c   :  { %v3119_v4 = vpack.c.bf16 %v3118_v42, %v3117_v3 }
0x1c0e   :  { %3804 = vmatmul.mubr.msk.bf16.vlgmr.msra.gmra.mxu1 %vm3159_vm5, %v3119_v4 }
0x1cce   :  { %v3197_v10 = vpop.f32.mrf.mxu1 }
0x1ccf   :  { %v3198_v11 = vadd.f32 %v3383_v9, %v3197_v10 }
0x1cd0   :  { %v3805_v12 = vpop.f32.mrf.mxu1 }
0x1cd1   :  { %v3204_v13 = vadd.f32 %v3198_v11, %v3047_v33 }
0x1cd2   :  { %v3200_v0 = vpop.f32.mrf.mxu1 }
0x1cd3   :  { %v3201_v46 = vadd.f32 %v3383_v9, %v3200_v0  ;;  %v3208_v14 = vsel %vm398_vm1, %v3204_v13, 0.0 }
0x1cd4   :  { %3209 = vadd.xlane.f32.xlu0 %v3208_v14  ;;  %v3806_v31 = vpop.f32.mrf.mxu1 }
0x1cd5   :  { %v3205_v17 = vadd.f32 %v3201_v46, %v3048_v40 }
0x1cd7   :  { %v3211_v18 = vsel %vm398_vm1, %v3205_v17, 0.0 }
0x1cd8   :  { %3212 = vadd.xlane.f32.xlu1 %v3211_v18 }
0x1d5d   :  { %v3210_v19 = vpop.xlane.xlu0 %3209 }
0x1d5e   :  { %v3214_v20 = vmul.f32 0.03125, %v3210_v19 }
0x1d60   :  { %v3216_v21 = vsub.f32 %v3204_v13, %v3214_v20 }
0x1d61   :  { %v3213_v23 = vpop.xlane.xlu1 %3212 }
0x1d62   :  { %v3215_v7 = vmul.f32 0.03125, %v3213_v23  ;;  %v3218_v8 = vmul.f32 %v3216_v21, %v3216_v21 }
0x1d64   :  { %v3217_v24 = vsub.f32 %v3205_v17, %v3215_v7  ;;  %v3220_v25 = vsel %vm398_vm1, %v3218_v8, 0.0 }
0x1d65   :  { %3221 = vadd.xlane.f32.xlu0 %v3220_v25 }
0x1d66   :  { %v3219_v26 = vmul.f32 %v3217_v24, %v3217_v24 }
0x1d68   :  { %v3223_v27 = vsel %vm398_vm1, %v3219_v26, 0.0 }
0x1d69   :  { %3224 = vadd.xlane.f32.xlu1 %v3223_v27 }
0x1dee   :  { %v3222_v29 = vpop.xlane.xlu0 %3221 }
0x1def   :  { %v3226_v32 = vmul.f32 0.03125, %v3222_v29 }
0x1df1   :  { %v3228_v38 = vadd.f32 1e-05, %v3226_v32 }
0x1df2   :  { %v3225_v39 = vpop.xlane.xlu1 %3224 }
0x1df3   :  { %3954 = vrsqrt.f32 %v3228_v38  ;;  %v3227_v41 = vmul.f32 0.03125, %v3225_v39 }
0x1df5   :  { %v3229_v44 = vadd.f32 1e-05, %v3227_v41 }
0x1df7   :  { %3956 = vrsqrt.f32 %v3229_v44 }
0x1e00   :  { %v3955_v45 = vpop.eup %3954 }
0x1e01   :  { %v3232_v5 = vmul.f32 %v3955_v45, %v3216_v21 }
0x1e03   :  { %v3240_v49 = vmul.f32 %v3389_v15, %v3232_v5 }
0x1e04   :  { %v3957_v16 = vpop.eup %3956 }
0x1e05   :  { %v3233_v50 = vmul.f32 %v3957_v16, %v3217_v24  ;;  %v3248_v30 = vadd.f32 %v3390_v47, %v3240_v49 }
0x1e07   :  { %v3241_v51 = vmul.f32 %v3389_v15, %v3233_v50  ;;  %3250 = vst.msk [vmem:[#allocation29] sm:$0xff] %vm398_vm1, %v3248_v30 }
0x1e09   :  { %v3249_v34 = vadd.f32 %v3390_v47, %v3241_v51 }
0x1e0b   :  { %3251 = vst.msk [vmem:[#allocation29 + $0x8] sm:$0xff] %vm398_vm1, %v3249_v34 }
0x1e0c   :  { %4309 = shalt.err (!%p4306_p5)
}
0x1e0d   :  { %3263 = dma.vmem_to_hbm [thread:$0]  %s3258_s17, 256, %s4553_s20, [#allocation4], %s4370_s0, %s4370_s0, %s4371_s26  }
0x1e0e   :  { %4336 = dma.done.wait [#allocation4], 256  }
0x1e0f   :  { %4337 = vsyncadd [#allocation4], 4294967040 }
0x1e10   :  { %3267 = vsyncpa [#allocation3], 1 }
0x1e11   :  { %3268 = vsyncpa [#allocation6], 1 }
0x1e12   :  { %3269 = vsyncpa [#allocation9], 1 }
0x1e13   :  { %3270 = vsyncpa [#allocation12], 1 }
0x1e14   :  { %3271 = vsyncpa [#allocation15], 1 }
0x1e15   :  { %3272 = vsyncpa [#allocation18], 1 }
0x1e16   :  { %3273 = vsyncpa [#allocation21], 1 }
0x1e17   :  { %3274 = vsyncpa [#allocation24], 1 }
0x1e18   :  { %3275 = vsyncpa [#allocation27], 1 }
0x1e19   :  { %3276 = vsyncpa [#allocation4], 1 }

</bundles_post_ra>
